<compile_context>
chip_gen: v7x
topology: tpu7x:2x2x1
jax: 0.10.0
libtpu: 0.0.40
codegen_flags: <defaults>
</compile_context>

<pallas_src>
import functools

import numpy as np

import jax
import jax.numpy as jnp
from jax import lax
from jax.experimental import pallas as pl
from jax.experimental.pallas import tpu as pltpu


# ----------------------------------------------------------------------------
# Host-side helpers
# ----------------------------------------------------------------------------
def _shuffle_selector(h_in):
    """(4*h_in^2, (2*h_in)^2) 0/1 matrix implementing the k=2, s=2 ConvTranspose
    pixel scatter.  Row = t*h_in^2 + (i*h_in + j) with tap t = 2*di + dj,
    column = (2*i + di)*(2*h_in) + (2*j + dj)."""
    h_out = 2 * h_in
    sel = np.zeros((4, h_in * h_in, h_out * h_out), np.float32)
    for di in range(2):
        for dj in range(2):
            t = 2 * di + dj
            for i in range(h_in):
                for j in range(h_in):
                    sel[t, i * h_in + j, (2 * i + di) * h_out + (2 * j + dj)] = 1.0
    return sel.reshape(4 * h_in * h_in, h_out * h_out)


def _batch_groups(n):
    """Grid steps for the batch axis: split across the 2 TensorCores on v7x,
    fold the whole (tiny) batch into one step on single-TC v5e/v6e."""
    try:
        kind = jax.devices()[0].device_kind.lower()
    except Exception:
        kind = ""
    if n > 4:
        return n                      # large batches: one sample per pipelined step
    if ("v7" in kind) and n % 2 == 0:
        return 2                      # one batch group per TensorCore
    return 1                          # single TC: no per-step overhead


# ----------------------------------------------------------------------------
# Fused decoder kernel (one grid step == one batch group of `nb` samples)
# ----------------------------------------------------------------------------
def _decoder_kernel(x_ref, w2_ref, b2_ref, e2_ref,
                    w1_ref, s1_ref, b1_ref, e1_ref,
                    w0_ref, s0_ref, b0_ref, e0_ref, o_ref,
                    *, nb, s2, c2, mxu_dtype):
    f32 = jnp.float32
    cin = x_ref.shape[-1]

    # ---- stage 2: ConvTranspose2d(128, 128, k) on the 1x1 bottleneck -------
    # One skinny MXU matmul over the flat (spatial-major) weight, then a small
    # repack so rows become spatial positions and lanes the 128 channels.
    x2 = x_ref[...].reshape(nb, cin).astype(mxu_dtype)
    out2 = jnp.dot(x2, w2_ref[...], preferred_element_type=f32)   # (nb, S2*C2)
    out2 = out2.reshape(nb * s2, c2)                              # (nb*S2, C2)
    e2m = e2_ref[...].reshape(nb * s2, c2)
    out2 = jnp.maximum(out2 + b2_ref[...] + e2m, 0.0)             # f32 bias+skip+relu
    out2 = out2.astype(mxu_dtype)

    for n in range(nb):                                           # nb is 1 or 2
        a2 = out2[n * s2:(n + 1) * s2, :]                         # (S2, C2)

        # ---- stage 1: ConvTranspose2d(128, 64, 2, 2) ---------------------
        # (a) one matmul for all 4 taps (RHS-transposed, q@k.T form):
        #     T1[t*C1 + c1, s2] = sum_c2 W1[t, c1, c2] * a2[s2, c2]
        t1 = lax.dot_general(w1_ref[...], a2, (((1,), (1,)), ((), ())),
                             preferred_element_type=f32)          # (4*C1, S2)
        c1 = t1.shape[0] // 4
        # (b) tap row-blocks -> column blocks: (C1, 4*S2)
        u1 = jnp.concatenate(
            [t1[t * c1:(t + 1) * c1, :] for t in range(4)], axis=1).astype(mxu_dtype)
        # (c) one scatter matmul with the concatenated 0/1 selector
        out1 = jnp.dot(u1, s1_ref[...], preferred_element_type=f32)   # (C1, S1)
        out1 = jnp.maximum(out1 + b1_ref[...] + e1_ref[n], 0.0)
        out1 = out1.astype(mxu_dtype)

        # ---- stage 0: ConvTranspose2d(64, C0, 2, 2), no relu --------------
        t0 = jnp.dot(w0_ref[...], out1, preferred_element_type=f32)   # (4*C0, S1)
        c0 = t0.shape[0] // 4
        u0 = jnp.concatenate(
            [t0[t * c0:(t + 1) * c0, :] for t in range(4)], axis=1).astype(mxu_dtype)
        out0 = jnp.dot(u0, s0_ref[...], preferred_element_type=f32)   # (C0, S0)
        out0 = out0 + b0_ref[...] + e0_ref[n]

        o_ref[n] = out0.astype(o_ref.dtype)                           # lane-dense store


# ----------------------------------------------------------------------------
# ResidualDecoder forward (single fused Pallas kernel)
# ----------------------------------------------------------------------------
def residual_decoder_forward(x, encodings, params, mxu_dtype=jnp.bfloat16):
    """x: (N, 128, 1, 1); encodings: [enc0, enc1, enc2] NCHW; params PyTorch-shaped."""
    w2, b2, w1, b1, w0, b0 = params
    N, cin, hx, wx = x.shape
    assert (hx, wx) == (1, 1), "deconv2 input must be the 1x1 encoder bottleneck"
    assert w1.shape[2:] == (2, 2) and w0.shape[2:] == (2, 2), \
        "pixel-shuffle path hard-codes kernel=stride=2 for deconv1/deconv0"

    k = w2.shape[2]
    c2, c1, c0 = w2.shape[1], w1.shape[1], w0.shape[1]
    s2 = k * k
    h1 = 2 * k
    s1 = h1 * h1
    h0 = 2 * h1
    s0 = h0 * h0
    assert encodings[2].shape == (N, c2, k, k)
    assert encodings[1].shape == (N, c1, h1, h1)
    assert encodings[0].shape == (N, c0, h0, h0)

    # One-time weight / selector re-layouts (tiny; would be folded into param
    # prep in deployment).  MXU operands in bf16; elementwise math stays f32.
    w2f = jnp.transpose(w2, (0, 2, 3, 1)).reshape(cin, s2 * c2).astype(mxu_dtype)
    w1s = jnp.transpose(w1, (2, 3, 1, 0)).reshape(4 * c1, c2).astype(mxu_dtype)
    w0s = jnp.transpose(w0, (2, 3, 1, 0)).reshape(4 * c0, c1).astype(mxu_dtype)
    sel1 = jnp.asarray(_shuffle_selector(k), dtype=mxu_dtype)     # (4*S2, S1), exact 0/1
    sel0 = jnp.asarray(_shuffle_selector(h1), dtype=mxu_dtype)    # (4*S1, S0), exact 0/1

    x3 = x.reshape(N, 1, cin)
    e2 = jnp.transpose(encodings[2], (0, 2, 3, 1)).reshape(N, s2, c2)  # spatial-major
    e1 = encodings[1].reshape(N, c1, s1)                               # natural NCHW
    e0 = encodings[0].reshape(N, c0, s0)                               # natural NCHW
    b2r = b2.reshape(1, c2)
    b1c = b1.reshape(c1, 1)
    b0c = b0.reshape(c0, 1)

    g = _batch_groups(N)
    nb = N // g

    kernel = functools.partial(_decoder_kernel, nb=nb, s2=s2, c2=c2,
                               mxu_dtype=mxu_dtype)

    batched = lambda gi: (gi, 0, 0)
    const2 = lambda gi: (0, 0)

    out = pl.pallas_call(
        kernel,
        out_shape=jax.ShapeDtypeStruct((N, c0, s0), x.dtype),
        grid_spec=pl.GridSpec(
            grid=(g,),
            in_specs=[
                pl.BlockSpec((nb, 1, cin), batched),        # x (per batch group)
                pl.BlockSpec((cin, s2 * c2), const2),       # deconv2 weight (flat)
                pl.BlockSpec((1, c2), const2),              # b2
                pl.BlockSpec((nb, s2, c2), batched),        # enc2 (spatial-major)
                pl.BlockSpec((4 * c1, c2), const2),         # deconv1 taps stacked
                pl.BlockSpec((4 * s2, s1), const2),         # stage-1 scatter selector
                pl.BlockSpec((c1, 1), const2),              # b1
                pl.BlockSpec((nb, c1, s1), batched),        # enc1 (channel-major)
                pl.BlockSpec((4 * c0, c1), const2),         # deconv0 taps stacked
                pl.BlockSpec((4 * s1, s0), const2),         # stage-0 scatter selector
                pl.BlockSpec((c0, 1), const2),              # b0
                pl.BlockSpec((nb, c0, s0), batched),        # enc0 (channel-major)
            ],
            out_specs=pl.BlockSpec((nb, c0, s0), batched),
        ),
        compiler_params=pltpu.CompilerParams(
            dimension_semantics=("parallel",)),
    )(x3, w2f, b2r, e2, w1s, sel1, b1c, e1, w0s, sel0, b0c, e0)

    return out.reshape(N, c0, h0, h0)                       # free reshape


# ----------------------------------------------------------------------------
# Pure-JAX f32 reference (einsum) for correctness check
# ----------------------------------------------------------------------------
def reference_forward(x, encodings, params):
    w2, b2, w1, b1, w0, b0 = params
    N = x.shape[0]
    k = w2.shape[2]
    x2d = x[:, :, 0, 0]
    out2 = jnp.einsum('nc,cdij->ndij', x2d, w2) + b2[None, :, None, None]
    out2 = jax.nn.relu(out2 + encodings[2])

    C1 = w1.shape[1]
    t1 = jnp.einsum('ncij,cdab->ndiajb', out2, w1).reshape(N, C1, 2 * k, 2 * k)
    out1 = jax.nn.relu(t1 + b1[None, :, None, None] + encodings[1])

    C0 = w0.shape[1]
    H1 = 2 * k
    t0 = jnp.einsum('ncij,cdab->ndiajb', out1, w0).reshape(N, C0, 2 * H1, 2 * H1)
    return t0 + b0[None, :, None, None] + encodings[0]


# ----------------------------------------------------------------------------
if __name__ == "__main__":
    # Module config (small): in_channels=4, input_size=16 -> deconv2 kernel = 4
    in_channels = 4
    input_size = 16
    k = input_size // 4
    N = 2

    key = jax.random.PRNGKey(0)
    keys = jax.random.split(key, 10)

    # ConvTranspose2d weights use PyTorch layout (in_ch, out_ch, kH, kW).
    w2 = jax.random.normal(keys[0], (128, 128, k, k), jnp.float32) * 0.05
    b2 = jax.random.normal(keys[1], (128,), jnp.float32) * 0.05
    w1 = jax.random.normal(keys[2], (128, 64, 2, 2), jnp.float32) * 0.05
    b1 = jax.random.normal(keys[3], (64,), jnp.float32) * 0.05
    w0 = jax.random.normal(keys[4], (64, in_channels, 2, 2), jnp.float32) * 0.05
    b0 = jax.random.normal(keys[5], (in_channels,), jnp.float32) * 0.05
    params = (w2, b2, w1, b1, w0, b0)

    # Inputs: bottleneck x and encoder skip connections (NCHW).
    x = jax.random.normal(keys[6], (N, 128, 1, 1), jnp.float32)
    enc2 = jax.random.normal(keys[7], (N, 128, k, k), jnp.float32)
    enc1 = jax.random.normal(keys[8], (N, 64, 2 * k, 2 * k), jnp.float32)
    enc0 = jax.random.normal(keys[9], (N, in_channels, 4 * k, 4 * k), jnp.float32)
    encodings = [enc0, enc1, enc2]

    fwd = jax.jit(residual_decoder_forward)
    out = jax.block_until_ready(fwd(x, encodings, params))
    ref = jax.block_until_ready(reference_forward(x, encodings, params))

    assert out.shape == (N, in_channels, input_size, input_size), out.shape
    # bf16 MXU operands with f32 accumulation: tolerance loosened vs. the pure
    # f32 reference (structural errors would still be O(1) and caught here).
    np.testing.assert_allclose(np.asarray(out), np.asarray(ref),
                               rtol=5e-2, atol=5e-2)
    print("KERNEL_OK")
</pallas_src>

<mosaic_0001>
module attributes {stable_mosaic.version = 11 : i64} {
  func.func @_decoder_kernel(%arg0: i32, %arg1: memref<2x1x128xf32, #tpu.memory_space<vmem>>, %arg2: memref<128x2048xbf16, #tpu.memory_space<vmem>>, %arg3: memref<1x128xf32, #tpu.memory_space<vmem>>, %arg4: memref<2x16x128xf32, #tpu.memory_space<vmem>>, %arg5: memref<256x128xbf16, #tpu.memory_space<vmem>>, %arg6: memref<64x64xbf16, #tpu.memory_space<vmem>>, %arg7: memref<64x1xf32, #tpu.memory_space<vmem>>, %arg8: memref<2x64x64xf32, #tpu.memory_space<vmem>>, %arg9: memref<16x64xbf16, #tpu.memory_space<vmem>>, %arg10: memref<256x256xbf16, #tpu.memory_space<vmem>>, %arg11: memref<4x1xf32, #tpu.memory_space<vmem>>, %arg12: memref<2x4x256xf32, #tpu.memory_space<vmem>>, %arg13: memref<2x4x256xf32, #tpu.memory_space<vmem>>) attributes {dimension_semantics = [#tpu.dimension_semantics<parallel>], iteration_bounds = array<i64: 1>, scalar_prefetch = 0 : i64, scratch_operands = 0 : i64, tpu.core_type = #tpu.core_type<tc>, window_params = [{transform_indices = @transform_0, window_bounds = array<i64: 2, 1, 128>}, {pipeline_mode = #tpu.pipeline_mode<synchronous>, transform_indices = @transform_1, window_bounds = array<i64: 128, 2048>}, {pipeline_mode = #tpu.pipeline_mode<synchronous>, transform_indices = @transform_2, window_bounds = array<i64: 1, 128>}, {transform_indices = @transform_3, window_bounds = array<i64: 2, 16, 128>}, {pipeline_mode = #tpu.pipeline_mode<synchronous>, transform_indices = @transform_4, window_bounds = array<i64: 256, 128>}, {pipeline_mode = #tpu.pipeline_mode<synchronous>, transform_indices = @transform_5, window_bounds = array<i64: 64, 64>}, {pipeline_mode = #tpu.pipeline_mode<synchronous>, transform_indices = @transform_6, window_bounds = array<i64: 64, 1>}, {transform_indices = @transform_7, window_bounds = array<i64: 2, 64, 64>}, {pipeline_mode = #tpu.pipeline_mode<synchronous>, transform_indices = @transform_8, window_bounds = array<i64: 16, 64>}, {pipeline_mode = #tpu.pipeline_mode<synchronous>, transform_indices = @transform_9, window_bounds = array<i64: 256, 256>}, {pipeline_mode = #tpu.pipeline_mode<synchronous>, transform_indices = @transform_10, window_bounds = array<i64: 4, 1>}, {transform_indices = @transform_11, window_bounds = array<i64: 2, 4, 256>}, {transform_indices = @transform_12, window_bounds = array<i64: 2, 4, 256>}]} {
    %c0 = arith.constant 0 : index
    %c0_0 = arith.constant 0 : index
    %c0_1 = arith.constant 0 : index
    %0 = vector.load %arg1[%c0, %c0_0, %c0_1] : memref<2x1x128xf32, #tpu.memory_space<vmem>>, vector<2x1x128xf32>
    %1 = vector.shape_cast %0 : vector<2x1x128xf32> to vector<2x128xf32>
    %2 = arith.truncf %1 : vector<2x128xf32> to vector<2x128xbf16>
    %c0_2 = arith.constant 0 : index
    %c0_3 = arith.constant 0 : index
    %3 = vector.load %arg2[%c0_2, %c0_3] : memref<128x2048xbf16, #tpu.memory_space<vmem>>, vector<128x2048xbf16>
    %cst = arith.constant dense<0.000000e+00> : vector<2x2048xf32>
    %4 = tpu.matmul %2, %3, %cst {dimension_numbers = #tpu.dot_dimension_numbers<[1], [0], [0], [1], [0, 0, 1, 1], [], []>} : vector<2x128xbf16>, vector<128x2048xbf16>, vector<2x2048xf32> -> vector<2x2048xf32>
    %5 = vector.shape_cast %4 : vector<2x2048xf32> to vector<32x128xf32>
    %c0_4 = arith.constant 0 : index
    %c0_5 = arith.constant 0 : index
    %c0_6 = arith.constant 0 : index
    %6 = vector.load %arg4[%c0_4, %c0_5, %c0_6] : memref<2x16x128xf32, #tpu.memory_space<vmem>>, vector<2x16x128xf32>
    %7 = vector.shape_cast %6 : vector<2x16x128xf32> to vector<32x128xf32>
    %c0_7 = arith.constant 0 : index
    %c0_8 = arith.constant 0 : index
    %8 = vector.load %arg3[%c0_7, %c0_8] : memref<1x128xf32, #tpu.memory_space<vmem>>, vector<1x128xf32>
    %9 = vector.broadcast %8 : vector<1x128xf32> to vector<32x128xf32>
    %10 = arith.addf %5, %9 : vector<32x128xf32>
    %11 = arith.addf %10, %7 : vector<32x128xf32>
    %cst_9 = arith.constant 0.000000e+00 : f32
    %12 = vector.broadcast %cst_9 : f32 to vector<32x128xf32>
    %13 = arith.maximumf %11, %12 : vector<32x128xf32>
    %14 = arith.truncf %13 : vector<32x128xf32> to vector<32x128xbf16>
    %15 = vector.extract_strided_slice %14 {offsets = [0, 0], sizes = [16, 128], strides = [1, 1]} : vector<32x128xbf16> to vector<16x128xbf16>
    %c0_10 = arith.constant 0 : index
    %c0_11 = arith.constant 0 : index
    %16 = vector.load %arg5[%c0_10, %c0_11] : memref<256x128xbf16, #tpu.memory_space<vmem>>, vector<256x128xbf16>
    %cst_12 = arith.constant dense<0.000000e+00> : vector<256x16xf32>
    %17 = tpu.matmul %16, %15, %cst_12 {dimension_numbers = #tpu.dot_dimension_numbers<[1], [1], [0], [0], [0, 0, 1, 0], [], []>} : vector<256x128xbf16>, vector<16x128xbf16>, vector<256x16xf32> -> vector<256x16xf32>
    %18 = vector.extract_strided_slice %17 {offsets = [0, 0], sizes = [64, 16], strides = [1, 1]} : vector<256x16xf32> to vector<64x16xf32>
    %19 = vector.extract_strided_slice %17 {offsets = [64, 0], sizes = [64, 16], strides = [1, 1]} : vector<256x16xf32> to vector<64x16xf32>
    %20 = vector.extract_strided_slice %17 {offsets = [128, 0], sizes = [64, 16], strides = [1, 1]} : vector<256x16xf32> to vector<64x16xf32>
    %21 = vector.extract_strided_slice %17 {offsets = [192, 0], sizes = [64, 16], strides = [1, 1]} : vector<256x16xf32> to vector<64x16xf32>
    %22 = tpu.concatenate %18, %19, %20, %21 in 1 : vector<64x16xf32>, vector<64x16xf32>, vector<64x16xf32>, vector<64x16xf32> -> vector<64x64xf32>
    %23 = arith.truncf %22 : vector<64x64xf32> to vector<64x64xbf16>
    %c0_13 = arith.constant 0 : index
    %c0_14 = arith.constant 0 : index
    %24 = vector.load %arg6[%c0_13, %c0_14] : memref<64x64xbf16, #tpu.memory_space<vmem>>, vector<64x64xbf16>
    %cst_15 = arith.constant dense<0.000000e+00> : vector<64x64xf32>
    %25 = tpu.matmul %23, %24, %cst_15 {dimension_numbers = #tpu.dot_dimension_numbers<[1], [0], [0], [1], [0, 0, 1, 1], [], []>} : vector<64x64xbf16>, vector<64x64xbf16>, vector<64x64xf32> -> vector<64x64xf32>
    %c0_16 = arith.constant 0 : index
    %c0_17 = arith.constant 0 : index
    %26 = vector.load %arg7[%c0_16, %c0_17] : memref<64x1xf32, #tpu.memory_space<vmem>>, vector<64x1xf32>
    %27 = vector.broadcast %26 : vector<64x1xf32> to vector<64x64xf32>
    %28 = arith.addf %25, %27 : vector<64x64xf32>
    %c0_18 = arith.constant 0 : index
    %c0_19 = arith.constant 0 : index
    %c0_20 = arith.constant 0 : index
    %29 = vector.load %arg8[%c0_18, %c0_19, %c0_20] : memref<2x64x64xf32, #tpu.memory_space<vmem>>, vector<1x64x64xf32>
    %30 = vector.shape_cast %29 : vector<1x64x64xf32> to vector<64x64xf32>
    %31 = arith.addf %28, %30 : vector<64x64xf32>
    %cst_21 = arith.constant 0.000000e+00 : f32
    %32 = vector.broadcast %cst_21 : f32 to vector<64x64xf32>
    %33 = arith.maximumf %31, %32 : vector<64x64xf32>
    %34 = arith.truncf %33 : vector<64x64xf32> to vector<64x64xbf16>
    %c0_22 = arith.constant 0 : index
    %c0_23 = arith.constant 0 : index
    %35 = vector.load %arg9[%c0_22, %c0_23] : memref<16x64xbf16, #tpu.memory_space<vmem>>, vector<16x64xbf16>
    %cst_24 = arith.constant dense<0.000000e+00> : vector<16x64xf32>
    %36 = tpu.matmul %35, %34, %cst_24 {dimension_numbers = #tpu.dot_dimension_numbers<[1], [0], [0], [1], [0, 0, 1, 1], [], []>} : vector<16x64xbf16>, vector<64x64xbf16>, vector<16x64xf32> -> vector<16x64xf32>
    %37 = vector.extract_strided_slice %36 {offsets = [0, 0], sizes = [4, 64], strides = [1, 1]} : vector<16x64xf32> to vector<4x64xf32>
    %38 = vector.extract_strided_slice %36 {offsets = [4, 0], sizes = [4, 64], strides = [1, 1]} : vector<16x64xf32> to vector<4x64xf32>
    %39 = vector.extract_strided_slice %36 {offsets = [8, 0], sizes = [4, 64], strides = [1, 1]} : vector<16x64xf32> to vector<4x64xf32>
    %40 = vector.extract_strided_slice %36 {offsets = [12, 0], sizes = [4, 64], strides = [1, 1]} : vector<16x64xf32> to vector<4x64xf32>
    %41 = tpu.concatenate %37, %38, %39, %40 in 1 : vector<4x64xf32>, vector<4x64xf32>, vector<4x64xf32>, vector<4x64xf32> -> vector<4x256xf32>
    %42 = arith.truncf %41 : vector<4x256xf32> to vector<4x256xbf16>
    %c0_25 = arith.constant 0 : index
    %c0_26 = arith.constant 0 : index
    %43 = vector.load %arg10[%c0_25, %c0_26] : memref<256x256xbf16, #tpu.memory_space<vmem>>, vector<256x256xbf16>
    %cst_27 = arith.constant dense<0.000000e+00> : vector<4x256xf32>
    %44 = tpu.matmul %42, %43, %cst_27 {dimension_numbers = #tpu.dot_dimension_numbers<[1], [0], [0], [1], [0, 0, 1, 1], [], []>} : vector<4x256xbf16>, vector<256x256xbf16>, vector<4x256xf32> -> vector<4x256xf32>
    %c0_28 = arith.constant 0 : index
    %c0_29 = arith.constant 0 : index
    %45 = vector.load %arg11[%c0_28, %c0_29] : memref<4x1xf32, #tpu.memory_space<vmem>>, vector<4x1xf32>
    %46 = vector.broadcast %45 : vector<4x1xf32> to vector<4x256xf32>
    %47 = arith.addf %44, %46 : vector<4x256xf32>
    %c0_30 = arith.constant 0 : index
    %c0_31 = arith.constant 0 : index
    %c0_32 = arith.constant 0 : index
    %48 = vector.load %arg12[%c0_30, %c0_31, %c0_32] : memref<2x4x256xf32, #tpu.memory_space<vmem>>, vector<1x4x256xf32>
    %49 = vector.shape_cast %48 : vector<1x4x256xf32> to vector<4x256xf32>
    %50 = arith.addf %47, %49 : vector<4x256xf32>
    %c0_33 = arith.constant 0 : index
    %c0_34 = arith.constant 0 : index
    %c0_35 = arith.constant 0 : index
    %51 = vector.load %arg13[%c0_33, %c0_34, %c0_35] : memref<2x4x256xf32, #tpu.memory_space<vmem>>, vector<1x4x256xf32>
    %52 = vector.shape_cast %51 : vector<1x4x256xf32> to vector<4x256xf32>
    %53 = vector.shape_cast %50 : vector<4x256xf32> to vector<1x4x256xf32>
    tpu.vector_store %arg13[%c0_33, %c0_34, %c0_35], %53 {strides = array<i32>} : memref<2x4x256xf32, #tpu.memory_space<vmem>>, vector<1x4x256xf32>,
    %54 = vector.extract_strided_slice %14 {offsets = [16, 0], sizes = [16, 128], strides = [1, 1]} : vector<32x128xbf16> to vector<16x128xbf16>
    %c0_36 = arith.constant 0 : index
    %c0_37 = arith.constant 0 : index
    %55 = vector.load %arg5[%c0_36, %c0_37] : memref<256x128xbf16, #tpu.memory_space<vmem>>, vector<256x128xbf16>
    %cst_38 = arith.constant dense<0.000000e+00> : vector<256x16xf32>
    %56 = tpu.matmul %55, %54, %cst_38 {dimension_numbers = #tpu.dot_dimension_numbers<[1], [1], [0], [0], [0, 0, 1, 0], [], []>} : vector<256x128xbf16>, vector<16x128xbf16>, vector<256x16xf32> -> vector<256x16xf32>
    %57 = vector.extract_strided_slice %56 {offsets = [0, 0], sizes = [64, 16], strides = [1, 1]} : vector<256x16xf32> to vector<64x16xf32>
    %58 = vector.extract_strided_slice %56 {offsets = [64, 0], sizes = [64, 16], strides = [1, 1]} : vector<256x16xf32> to vector<64x16xf32>
    %59 = vector.extract_strided_slice %56 {offsets = [128, 0], sizes = [64, 16], strides = [1, 1]} : vector<256x16xf32> to vector<64x16xf32>
    %60 = vector.extract_strided_slice %56 {offsets = [192, 0], sizes = [64, 16], strides = [1, 1]} : vector<256x16xf32> to vector<64x16xf32>
    %61 = tpu.concatenate %57, %58, %59, %60 in 1 : vector<64x16xf32>, vector<64x16xf32>, vector<64x16xf32>, vector<64x16xf32> -> vector<64x64xf32>
    %62 = arith.truncf %61 : vector<64x64xf32> to vector<64x64xbf16>
    %c0_39 = arith.constant 0 : index
    %c0_40 = arith.constant 0 : index
    %63 = vector.load %arg6[%c0_39, %c0_40] : memref<64x64xbf16, #tpu.memory_space<vmem>>, vector<64x64xbf16>
    %cst_41 = arith.constant dense<0.000000e+00> : vector<64x64xf32>
    %64 = tpu.matmul %62, %63, %cst_41 {dimension_numbers = #tpu.dot_dimension_numbers<[1], [0], [0], [1], [0, 0, 1, 1], [], []>} : vector<64x64xbf16>, vector<64x64xbf16>, vector<64x64xf32> -> vector<64x64xf32>
    %c0_42 = arith.constant 0 : index
    %c0_43 = arith.constant 0 : index
    %65 = vector.load %arg7[%c0_42, %c0_43] : memref<64x1xf32, #tpu.memory_space<vmem>>, vector<64x1xf32>
    %66 = vector.broadcast %65 : vector<64x1xf32> to vector<64x64xf32>
    %67 = arith.addf %64, %66 : vector<64x64xf32>
    %c1 = arith.constant 1 : index
    %c0_44 = arith.constant 0 : index
    %c0_45 = arith.constant 0 : index
    %68 = vector.load %arg8[%c1, %c0_44, %c0_45] : memref<2x64x64xf32, #tpu.memory_space<vmem>>, vector<1x64x64xf32>
    %69 = vector.shape_cast %68 : vector<1x64x64xf32> to vector<64x64xf32>
    %70 = arith.addf %67, %69 : vector<64x64xf32>
    %cst_46 = arith.constant 0.000000e+00 : f32
    %71 = vector.broadcast %cst_46 : f32 to vector<64x64xf32>
    %72 = arith.maximumf %70, %71 : vector<64x64xf32>
    %73 = arith.truncf %72 : vector<64x64xf32> to vector<64x64xbf16>
    %c0_47 = arith.constant 0 : index
    %c0_48 = arith.constant 0 : index
    %74 = vector.load %arg9[%c0_47, %c0_48] : memref<16x64xbf16, #tpu.memory_space<vmem>>, vector<16x64xbf16>
    %cst_49 = arith.constant dense<0.000000e+00> : vector<16x64xf32>
    %75 = tpu.matmul %74, %73, %cst_49 {dimension_numbers = #tpu.dot_dimension_numbers<[1], [0], [0], [1], [0, 0, 1, 1], [], []>} : vector<16x64xbf16>, vector<64x64xbf16>, vector<16x64xf32> -> vector<16x64xf32>
    %76 = vector.extract_strided_slice %75 {offsets = [0, 0], sizes = [4, 64], strides = [1, 1]} : vector<16x64xf32> to vector<4x64xf32>
    %77 = vector.extract_strided_slice %75 {offsets = [4, 0], sizes = [4, 64], strides = [1, 1]} : vector<16x64xf32> to vector<4x64xf32>
    %78 = vector.extract_strided_slice %75 {offsets = [8, 0], sizes = [4, 64], strides = [1, 1]} : vector<16x64xf32> to vector<4x64xf32>
    %79 = vector.extract_strided_slice %75 {offsets = [12, 0], sizes = [4, 64], strides = [1, 1]} : vector<16x64xf32> to vector<4x64xf32>
    %80 = tpu.concatenate %76, %77, %78, %79 in 1 : vector<4x64xf32>, vector<4x64xf32>, vector<4x64xf32>, vector<4x64xf32> -> vector<4x256xf32>
    %81 = arith.truncf %80 : vector<4x256xf32> to vector<4x256xbf16>
    %c0_50 = arith.constant 0 : index
    %c0_51 = arith.constant 0 : index
    %82 = vector.load %arg10[%c0_50, %c0_51] : memref<256x256xbf16, #tpu.memory_space<vmem>>, vector<256x256xbf16>
    %cst_52 = arith.constant dense<0.000000e+00> : vector<4x256xf32>
    %83 = tpu.matmul %81, %82, %cst_52 {dimension_numbers = #tpu.dot_dimension_numbers<[1], [0], [0], [1], [0, 0, 1, 1], [], []>} : vector<4x256xbf16>, vector<256x256xbf16>, vector<4x256xf32> -> vector<4x256xf32>
    %c0_53 = arith.constant 0 : index
    %c0_54 = arith.constant 0 : index
    %84 = vector.load %arg11[%c0_53, %c0_54] : memref<4x1xf32, #tpu.memory_space<vmem>>, vector<4x1xf32>
    %85 = vector.broadcast %84 : vector<4x1xf32> to vector<4x256xf32>
    %86 = arith.addf %83, %85 : vector<4x256xf32>
    %c1_55 = arith.constant 1 : index
    %c0_56 = arith.constant 0 : index
    %c0_57 = arith.constant 0 : index
    %87 = vector.load %arg12[%c1_55, %c0_56, %c0_57] : memref<2x4x256xf32, #tpu.memory_space<vmem>>, vector<1x4x256xf32>
    %88 = vector.shape_cast %87 : vector<1x4x256xf32> to vector<4x256xf32>
    %89 = arith.addf %86, %88 : vector<4x256xf32>
    %c1_58 = arith.constant 1 : index
    %c0_59 = arith.constant 0 : index
    %c0_60 = arith.constant 0 : index
    %90 = vector.load %arg13[%c1_58, %c0_59, %c0_60] : memref<2x4x256xf32, #tpu.memory_space<vmem>>, vector<1x4x256xf32>
    %91 = vector.shape_cast %90 : vector<1x4x256xf32> to vector<4x256xf32>
    %92 = vector.shape_cast %89 : vector<4x256xf32> to vector<1x4x256xf32>
    tpu.vector_store %arg13[%c1_58, %c0_59, %c0_60], %92 {strides = array<i32>} : memref<2x4x256xf32, #tpu.memory_space<vmem>>, vector<1x4x256xf32>,
    return
  }
  func.func @transform_0(%arg0: i32) -> (i32, i32, i32) {
    %c0_i32 = arith.constant 0 : i32
    %c0_i32_0 = arith.constant 0 : i32
    %c0_i32_1 = arith.constant 0 : i32
    return %arg0, %c0_i32, %c0_i32_0 : i32, i32, i32
  }
  func.func @transform_1(%arg0: i32) -> (i32, i32) {
    %c0_i32 = arith.constant 0 : i32
    %c0_i32_0 = arith.constant 0 : i32
    %c0_i32_1 = arith.constant 0 : i32
    return %c0_i32, %c0_i32_0 : i32, i32
  }
  func.func @transform_2(%arg0: i32) -> (i32, i32) {
    %c0_i32 = arith.constant 0 : i32
    %c0_i32_0 = arith.constant 0 : i32
    %c0_i32_1 = arith.constant 0 : i32
    return %c0_i32, %c0_i32_0 : i32, i32
  }
  func.func @transform_3(%arg0: i32) -> (i32, i32, i32) {
    %c0_i32 = arith.constant 0 : i32
    %c0_i32_0 = arith.constant 0 : i32
    %c0_i32_1 = arith.constant 0 : i32
    return %arg0, %c0_i32, %c0_i32_0 : i32, i32, i32
  }
  func.func @transform_4(%arg0: i32) -> (i32, i32) {
    %c0_i32 = arith.constant 0 : i32
    %c0_i32_0 = arith.constant 0 : i32
    %c0_i32_1 = arith.constant 0 : i32
    return %c0_i32, %c0_i32_0 : i32, i32
  }
  func.func @transform_5(%arg0: i32) -> (i32, i32) {
    %c0_i32 = arith.constant 0 : i32
    %c0_i32_0 = arith.constant 0 : i32
    %c0_i32_1 = arith.constant 0 : i32
    return %c0_i32, %c0_i32_0 : i32, i32
  }
  func.func @transform_6(%arg0: i32) -> (i32, i32) {
    %c0_i32 = arith.constant 0 : i32
    %c0_i32_0 = arith.constant 0 : i32
    %c0_i32_1 = arith.constant 0 : i32
    return %c0_i32, %c0_i32_0 : i32, i32
  }
  func.func @transform_7(%arg0: i32) -> (i32, i32, i32) {
    %c0_i32 = arith.constant 0 : i32
    %c0_i32_0 = arith.constant 0 : i32
    %c0_i32_1 = arith.constant 0 : i32
    return %arg0, %c0_i32, %c0_i32_0 : i32, i32, i32
  }
  func.func @transform_8(%arg0: i32) -> (i32, i32) {
    %c0_i32 = arith.constant 0 : i32
    %c0_i32_0 = arith.constant 0 : i32
    %c0_i32_1 = arith.constant 0 : i32
    return %c0_i32, %c0_i32_0 : i32, i32
  }
  func.func @transform_9(%arg0: i32) -> (i32, i32) {
    %c0_i32 = arith.constant 0 : i32
    %c0_i32_0 = arith.constant 0 : i32
    %c0_i32_1 = arith.constant 0 : i32
    return %c0_i32, %c0_i32_0 : i32, i32
  }
  func.func @transform_10(%arg0: i32) -> (i32, i32) {
    %c0_i32 = arith.constant 0 : i32
    %c0_i32_0 = arith.constant 0 : i32
    %c0_i32_1 = arith.constant 0 : i32
    return %c0_i32, %c0_i32_0 : i32, i32
  }
  func.func @transform_11(%arg0: i32) -> (i32, i32, i32) {
    %c0_i32 = arith.constant 0 : i32
    %c0_i32_0 = arith.constant 0 : i32
    %c0_i32_1 = arith.constant 0 : i32
    return %arg0, %c0_i32, %c0_i32_0 : i32, i32, i32
  }
  func.func @transform_12(%arg0: i32) -> (i32, i32, i32) {
    %c0_i32 = arith.constant 0 : i32
    %c0_i32_0 = arith.constant 0 : i32
    %c0_i32_1 = arith.constant 0 : i32
    return %arg0, %c0_i32, %c0_i32_0 : i32, i32, i32
  }
}

</mosaic_0001>

<bundles_post_ra>
// kernel: residual_decoder_forward.1
= control target key start
LH: loop header
LB: loop body
LE: loop exit
PB: predicated region body
PF: predicated region fallthrough
CT: control target
= control target key end

     0   :  { %v3836_v3 = vmov 0   ;;  %vm179_vm0 = vcmask 1041409   ;;  %s3838_s16 = smov 16   ;;  %s3839_s22 = smov 32   ;;  %vm1713_vm1 = vcmask 130048   ;;  %vm1722_vm2 = vcmask 261120   ;;  %s4856_s1 = inlined_call_operand.vmem [shape: bf16[128,2048], index: 1, kind: input, shape index: {}]   ;;  %s4857_s0 = inlined_call_operand.vmem [shape: f32[2,1,128], index: 0, kind: input, shape index: {}]   ;;  %s4858_s4 = inlined_call_operand.vmem [shape: bf16[256,128], index: 4, kind: input, shape index: {}]   ;;  %s4859_s2 = inlined_call_operand.vmem [shape: f32[1,128], index: 2, kind: input, shape index: {}]   ;;  %s4860_s3 = inlined_call_operand.vmem [shape: f32[2,16,128], index: 3, kind: input, shape index: {}]   ;;  %s4861_s5 = inlined_call_operand.vmem [shape: bf16[64,64], index: 5, kind: input, shape index: {}]   ;;  %s4862_s6 = inlined_call_operand.vmem [shape: f32[64,1], index: 6, kind: input, shape index: {}]   ;;  %s4863_s8 = inlined_call_operand.vmem [shape: bf16[16,64], index: 8, kind: input, shape index: {}]   ;;  %s4864_s7 = inlined_call_operand.vmem [shape: f32[2,64,64], index: 7, kind: input, shape index: {}]   ;;  %s4865_s9 = inlined_call_operand.vmem [shape: bf16[256,256], index: 9, kind: input, shape index: {}]   ;;  %s4866_s10 = inlined_call_operand.vmem [shape: f32[4,1], index: 10, kind: input, shape index: {}]   ;;  %s4867_s11 = inlined_call_operand.vmem [shape: f32[2,4,256], index: 11, kind: input, shape index: {}]   ;;  %s4868_s12 = inlined_call_operand.vmem [shape: f32[2,4,256], index: 12, kind: output, shape index: {}]  }
   0x1   :  { %v46_v0 = vld [vmem:[%s4856_s1] sm:$0xff]  ;;  %v47_v2 = vld [vmem:[%s4856_s1 + $0x8] sm:$0xff]  ;;  %855 = vmatprep.mubr.bf16.mxu0 %v3836_v3  ;;  %896 = vmatprep.mubr.bf16.mxu1 %v3836_v3  ;;  %s3840_s24 = smov 48   ;;  %vm1731_vm3 = vcmask 392192   ;;  %vm1824_vm4 = vcmask 523264   ;;  %vm3842_vm5 = vmmov 0  }
   0x2   :  { %v54_v1 = vld [vmem:[%s4856_s1 + $0x40] sm:$0xff]  ;;  %v55_v5 = vld [vmem:[%s4856_s1 + $0x48] sm:$0xff]  ;;  %3673 = vset.pattern.permute.xlu1 %v3836_v3  ;;  %3672 = vset.pattern.permute.xlu0 %v3836_v3  ;;  %s3843_s30 = smov 64  }
   0x3   :  { %v3166_v4 = vcombine.high %v46_v0, %v54_v1  ;;  %v3165_v6 = vcombine.low %v46_v0, %v54_v1  ;;  %v62_v7 = vld [vmem:[%s4856_s1 + $0x80] sm:$0xff]  ;;  %v3168_v9 = vcombine.high %v47_v2, %v55_v5  ;;  %v3167_v10 = vcombine.low %v47_v2, %v55_v5  ;;  %v63_v12 = vld [vmem:[%s4856_s1 + $0x88] sm:$0xff] }
   0x4   :  { %v70_v8 = vld [vmem:[%s4856_s1 + $0xc0] sm:$0xff]  ;;  %v71_v13 = vld [vmem:[%s4856_s1 + $0xc8] sm:$0xff] }
   0x5   :  { %v3182_v11 = vcombine.high %v62_v7, %v70_v8  ;;  %v78_v14 = vld [vmem:[%s4856_s1 + $0x100] sm:$0xff]  ;;  %823 = vmatprep.subr.bf16.mxu0 %v3166_v4  ;;  %v3184_v15 = vcombine.high %v63_v12, %v71_v13  ;;  %v79_v17 = vld [vmem:[%s4856_s1 + $0x108] sm:$0xff]  ;;  %864 = vmatprep.subr.bf16.mxu1 %v3168_v9  ;;  %v3181_v19 = vcombine.low %v62_v7, %v70_v8  ;;  %v48_v7 = vld [vmem:[%s4856_s1 + $0x10] sm:$0xff] }
   0x6   :  { %v86_v16 = vld [vmem:[%s4856_s1 + $0x140] sm:$0xff]  ;;  %v87_v18 = vld [vmem:[%s4856_s1 + $0x148] sm:$0xff]  ;;  %824 = vmatpush1.bf16.msra.mxu0 %v3165_v6  ;;  %865 = vmatpush1.bf16.msra.mxu1 %v3167_v10  ;;  %v3183_v20 = vcombine.low %v63_v12, %v71_v13  ;;  %v56_v8 = vld [vmem:[%s4856_s1 + $0x50] sm:$0xff] }
   0x7   :  { %825 = vmatprep.subr.bf16.mxu0 %v3182_v11  ;;  %v3198_v21 = vcombine.high %v78_v14, %v86_v16  ;;  %866 = vmatprep.subr.bf16.mxu1 %v3184_v15  ;;  %v3200_v22 = vcombine.high %v79_v17, %v87_v18  ;;  %v94_v23 = vld [vmem:[%s4856_s1 + $0x180] sm:$0xff]  ;;  %v95_v25 = vld [vmem:[%s4856_s1 + $0x188] sm:$0xff]  ;;  %v3197_v27 = vcombine.low %v78_v14, %v86_v16  ;;  %v49_v9 = vld [vmem:[%s4856_s1 + $0x18] sm:$0xff] }
   0x8   :  { %v102_v24 = vld [vmem:[%s4856_s1 + $0x1c0] sm:$0xff]  ;;  %v103_v26 = vld [vmem:[%s4856_s1 + $0x1c8] sm:$0xff]  ;;  %v3199_v28 = vcombine.low %v79_v17, %v87_v18  ;;  %v57_v10 = vld [vmem:[%s4856_s1 + $0x58] sm:$0xff]  ;;  %v3170_v14 = vcombine.high %v48_v7, %v56_v8 }
   0x9   :  { %v3214_v29 = vcombine.high %v94_v23, %v102_v24  ;;  %v3216_v30 = vcombine.high %v95_v25, %v103_v26  ;;  %v110_v31 = vld [vmem:[%s4856_s1 + $0x200] sm:$0xff]  ;;  %v111_v33 = vld [vmem:[%s4856_s1 + $0x208] sm:$0xff]  ;;  %v3213_v35 = vcombine.low %v94_v23, %v102_v24  ;;  %v3215_v36 = vcombine.low %v95_v25, %v103_v26  ;;  %v64_v16 = vld [vmem:[%s4856_s1 + $0x90] sm:$0xff] }
   0xa   :  { %826 = vmatpush1.bf16.msra.mxu0 %v3181_v19  ;;  %867 = vmatpush1.bf16.msra.mxu1 %v3183_v20  ;;  %v118_v32 = vld [vmem:[%s4856_s1 + $0x240] sm:$0xff]  ;;  %v119_v34 = vld [vmem:[%s4856_s1 + $0x248] sm:$0xff]  ;;  %v3172_v15 = vcombine.high %v49_v9, %v57_v10  ;;  %v72_v17 = vld [vmem:[%s4856_s1 + $0xd0] sm:$0xff] }
   0xb   :  { %827 = vmatprep.subr.bf16.mxu0 %v3198_v21  ;;  %868 = vmatprep.subr.bf16.mxu1 %v3200_v22  ;;  %v3230_v37 = vcombine.high %v110_v31, %v118_v32  ;;  %v43_v38 = vld [vmem:[%s4857_s0 + $0x1] sm:$0x1]  ;;  %v3232_v39 = vcombine.high %v111_v33, %v119_v34  ;;  %v127_v42 = vld [vmem:[%s4856_s1 + $0x288] sm:$0xff]  ;;  %v3229_v44 = vcombine.low %v110_v31, %v118_v32  ;;  %v42_v48 = vld [vmem:[%s4857_s0] sm:$0x1] }
   0xc   :  { %v126_v40 = vld [vmem:[%s4856_s1 + $0x280] sm:$0xff]  ;;  %v135_v43 = vld [vmem:[%s4856_s1 + $0x2c8] sm:$0xff]  ;;  %v45_v45 = vpack.c.bf16 %v43_v38, %v43_v38  ;;  %v3231_v46 = vcombine.low %v111_v33, %v119_v34  ;;  %v44_v55 = vpack.c.bf16 %v42_v48, %v42_v48  ;;  %v65_v19 = vld [vmem:[%s4856_s1 + $0x98] sm:$0xff]  ;;  %v3169_v21 = vcombine.low %v48_v7, %v56_v8 }
   0xd   :  { %v134_v41 = vld [vmem:[%s4856_s1 + $0x2c0] sm:$0xff]  ;;  %v3248_v49 = vcombine.high %v127_v42, %v135_v43  ;;  %v143_v52 = vld [vmem:[%s4856_s1 + $0x308] sm:$0xff]  ;;  %v3247_v57 = vcombine.low %v127_v42, %v135_v43  ;;  %v73_v20 = vld [vmem:[%s4856_s1 + $0xd8] sm:$0xff]  ;;  %v3171_v22 = vcombine.low %v49_v9, %v57_v10  ;;  %v3186_v23 = vcombine.high %v64_v16, %v72_v17 }
   0xe   :  { %828 = vmatpush1.bf16.msra.mxu0 %v3197_v27  ;;  %869 = vmatpush1.bf16.msra.mxu1 %v3199_v28  ;;  %v3246_v47 = vcombine.high %v126_v40, %v134_v41  ;;  %v142_v50 = vld [vmem:[%s4856_s1 + $0x300] sm:$0xff]  ;;  %v151_v53 = vld [vmem:[%s4856_s1 + $0x348] sm:$0xff]  ;;  %v3245_v54 = vcombine.low %v126_v40, %v134_v41  ;;  %v177_v56 = vunpack.c.l.b16 %v45_v45  ;;  %v176_v1 = vunpack.c.l.b16 %v44_v55  ;;  %v80_v25 = vld [vmem:[%s4856_s1 + $0x110] sm:$0xff] }
   0xf   :  { %829 = vmatprep.subr.bf16.mxu0 %v3214_v29  ;;  %870 = vmatprep.subr.bf16.mxu1 %v3216_v30  ;;  %v150_v51 = vld [vmem:[%s4856_s1 + $0x340] sm:$0xff]  ;;  %v3264_v59 = vcombine.high %v143_v52, %v151_v53  ;;  %v159_v62 = vld [vmem:[%s4856_s1 + $0x388] sm:$0xff]  ;;  %v3263_v4 = vcombine.low %v143_v52, %v151_v53  ;;  %v3188_v24 = vcombine.high %v65_v19, %v73_v20  ;;  %v88_v26 = vld [vmem:[%s4856_s1 + $0x150] sm:$0xff] }
  0x10   :  { %v3262_v58 = vcombine.high %v142_v50, %v150_v51  ;;  %v158_v60 = vld [vmem:[%s4856_s1 + $0x380] sm:$0xff]  ;;  %v167_v63 = vld [vmem:[%s4856_s1 + $0x3c8] sm:$0xff]  ;;  %v3261_v0 = vcombine.low %v142_v50, %v150_v51  ;;  %v178_v2 = vrot.slane %v177_v56, 7  ;;  %v81_v27 = vld [vmem:[%s4856_s1 + $0x118] sm:$0xff]  ;;  %v3185_v29 = vcombine.low %v64_v16, %v72_v17 }
  0x11   :  { %v166_v61 = vld [vmem:[%s4856_s1 + $0x3c0] sm:$0xff]  ;;  %v3280_v6 = vcombine.high %v159_v62, %v167_v63  ;;  %v3279_v13 = vcombine.low %v159_v62, %v167_v63  ;;  %v89_v28 = vld [vmem:[%s4856_s1 + $0x158] sm:$0xff]  ;;  %v3187_v30 = vcombine.low %v65_v19, %v73_v20  ;;  %v3202_v31 = vcombine.high %v80_v25, %v88_v26  ;;  %v96_v33 = vld [vmem:[%s4856_s1 + $0x190] sm:$0xff] }
  0x12   :  { %830 = vmatpush1.bf16.msra.mxu0 %v3213_v35  ;;  %871 = vmatpush1.bf16.msra.mxu1 %v3215_v36  ;;  %v3278_v5 = vcombine.high %v158_v60, %v166_v61  ;;  %v3277_v11 = vcombine.low %v158_v60, %v166_v61  ;;  %v180_v12 = vsel %vm179_vm0, %v178_v2, %v176_v1  ;;  %v104_v34 = vld [vmem:[%s4856_s1 + $0x1d0] sm:$0xff]  ;;  %v97_v35 = vld [vmem:[%s4856_s1 + $0x198] sm:$0xff]  ;;  %v50_v10 = vld [vmem:[%s4856_s1 + $0x20] sm:$0xff] }
  0x13   :  { %831 = vmatprep.subr.bf16.mxu0 %v3230_v37  ;;  %872 = vmatprep.subr.bf16.mxu1 %v3232_v39  ;;  %v4033_v18 = vpack.c.b16 %v180_v12, %v180_v12  ;;  %v3204_v32 = vcombine.high %v81_v27, %v89_v28  ;;  %v105_v36 = vld [vmem:[%s4856_s1 + $0x1d8] sm:$0xff]  ;;  %v3201_v37 = vcombine.low %v80_v25, %v88_v26  ;;  %v112_v41 = vld [vmem:[%s4856_s1 + $0x210] sm:$0xff]  ;;  %v51_v12 = vld [vmem:[%s4856_s1 + $0x28] sm:$0xff] }
  0x14   :  { %v3203_v38 = vcombine.low %v81_v27, %v89_v28  ;;  %v3218_v39 = vcombine.high %v96_v33, %v104_v34  ;;  %v3220_v40 = vcombine.high %v97_v35, %v105_v36  ;;  %v120_v42 = vld [vmem:[%s4856_s1 + $0x250] sm:$0xff]  ;;  %v113_v43 = vld [vmem:[%s4856_s1 + $0x218] sm:$0xff]  ;;  %v3217_v45 = vcombine.low %v96_v33, %v104_v34  ;;  %v66_v19 = vld [vmem:[%s4856_s1 + $0xa0] sm:$0xff] }
  0x15   :  { %v136_v50 = vld [vmem:[%s4856_s1 + $0x2d0] sm:$0xff]  ;;  %v129_v51 = vld [vmem:[%s4856_s1 + $0x298] sm:$0xff]  ;;  %v3233_v53 = vcombine.low %v112_v41, %v120_v42  ;;  %v74_v20 = vld [vmem:[%s4856_s1 + $0xe0] sm:$0xff] }
  0x16   :  { %832 = vmatpush1.bf16.msra.mxu0 %v3229_v44  ;;  %873 = vmatpush1.bf16.msra.mxu1 %v3231_v46  ;;  %v121_v44 = vld [vmem:[%s4856_s1 + $0x258] sm:$0xff]  ;;  %v3219_v46 = vcombine.low %v97_v35, %v105_v36  ;;  %v160_v1 = vld [vmem:[%s4856_s1 + $0x390] sm:$0xff]  ;;  %v3190_v25 = vcombine.high %v66_v19, %v74_v20  ;;  %v82_v27 = vld [vmem:[%s4856_s1 + $0x120] sm:$0xff] }
  0x17   :  { %833 = vmatprep.subr.bf16.mxu0 %v3246_v47  ;;  %874 = vmatprep.subr.bf16.mxu1 %v3248_v49  ;;  %v3234_v47 = vcombine.high %v112_v41, %v120_v42  ;;  %v3236_v48 = vcombine.high %v113_v43, %v121_v44  ;;  %v128_v49 = vld [vmem:[%s4856_s1 + $0x290] sm:$0xff]  ;;  %v137_v52 = vld [vmem:[%s4856_s1 + $0x2d8] sm:$0xff]  ;;  %v90_v28 = vld [vmem:[%s4856_s1 + $0x160] sm:$0xff] }
  0x18   :  { %v3250_v55 = vcombine.high %v128_v49, %v136_v50  ;;  %v3252_v56 = vcombine.high %v129_v51, %v137_v52  ;;  %v153_v60 = vld [vmem:[%s4856_s1 + $0x358] sm:$0xff]  ;;  %v3249_v61 = vcombine.low %v128_v49, %v136_v50  ;;  %v3251_v62 = vcombine.low %v129_v51, %v137_v52  ;;  %v168_v2 = vld [vmem:[%s4856_s1 + $0x3d0] sm:$0xff]  ;;  %v98_v35 = vld [vmem:[%s4856_s1 + $0x1a0] sm:$0xff] }
  0x19   :  { %v3282_v8 = vcombine.high %v160_v1, %v168_v2  ;;  %v3206_v33 = vcombine.high %v82_v27, %v90_v28  ;;  %v106_v36 = vld [vmem:[%s4856_s1 + $0x1e0] sm:$0xff] }
  0x1a   :  { %834 = vmatpush1.bf16.msra.mxu0 %v3245_v54  ;;  %875 = vmatpush1.bf16.msra.mxu1 %v3247_v57  ;;  %v3235_v54 = vcombine.low %v113_v43, %v121_v44  ;;  %v144_v57 = vld [vmem:[%s4856_s1 + $0x310] sm:$0xff]  ;;  %v3222_v41 = vcombine.high %v98_v35, %v106_v36  ;;  %v114_v43 = vld [vmem:[%s4856_s1 + $0x220] sm:$0xff] }
  0x1b   :  { %835 = vmatprep.subr.bf16.mxu0 %v3262_v58  ;;  %876 = vmatprep.subr.bf16.mxu1 %v3264_v59  ;;  %v152_v58 = vld [vmem:[%s4856_s1 + $0x350] sm:$0xff]  ;;  %v145_v59 = vld [vmem:[%s4856_s1 + $0x318] sm:$0xff]  ;;  %v122_v44 = vld [vmem:[%s4856_s1 + $0x260] sm:$0xff] }
  0x1c   :  { %v3266_v63 = vcombine.high %v144_v57, %v152_v58  ;;  %v3267_v7 = vcombine.low %v145_v59, %v153_v60  ;;  %v3238_v49 = vcombine.high %v114_v43, %v122_v44  ;;  %v130_v51 = vld [vmem:[%s4856_s1 + $0x2a0] sm:$0xff] }
  0x1d   :  { %v138_v52 = vld [vmem:[%s4856_s1 + $0x2e0] sm:$0xff] }
  0x1e   :  { %836 = vmatpush1.bf16.msra.mxu0 %v3261_v0  ;;  %877 = vmatpush1.bf16.msra.mxu1 %v3263_v4  ;;  %v3268_v0 = vcombine.high %v145_v59, %v153_v60  ;;  %v161_v4 = vld [vmem:[%s4856_s1 + $0x398] sm:$0xff]  ;;  %v146_v59 = vld [vmem:[%s4856_s1 + $0x320] sm:$0xff] }
  0x1f   :  { %837 = vmatprep.subr.bf16.mxu0 %v3278_v5  ;;  %878 = vmatprep.subr.bf16.mxu1 %v3280_v6  ;;  %v169_v5 = vld [vmem:[%s4856_s1 + $0x3d8] sm:$0xff]  ;;  %v3265_v6 = vcombine.low %v144_v57, %v152_v58  ;;  %v3254_v57 = vcombine.high %v130_v51, %v138_v52  ;;  %v154_v60 = vld [vmem:[%s4856_s1 + $0x360] sm:$0xff] }
  0x20   :  { %v3284_v9 = vcombine.high %v161_v4, %v169_v5 }
  0x22   :  { %838 = vmatpush1.bf16.msra.mxu0 %v3277_v11  ;;  %879 = vmatpush1.bf16.msra.mxu1 %v3279_v13  ;;  %v58_v11 = vld [vmem:[%s4856_s1 + $0x60] sm:$0xff]  ;;  %v59_v13 = vld [vmem:[%s4856_s1 + $0x68] sm:$0xff] }
  0x23   :  { %905 = vmatprep.subr.bf16.mxu0 %v3170_v14  ;;  %946 = vmatprep.subr.bf16.mxu1 %v3172_v15  ;;  %v3281_v14 = vcombine.low %v160_v1, %v168_v2  ;;  %v3283_v15 = vcombine.low %v161_v4, %v169_v5  ;;  %v3174_v16 = vcombine.high %v50_v10, %v58_v11  ;;  %v162_v4 = vld [vmem:[%s4856_s1 + $0x3a0] sm:$0xff] }
  0x24   :  { %v3176_v17 = vcombine.high %v51_v12, %v59_v13  ;;  %v3270_v1 = vcombine.high %v146_v59, %v154_v60  ;;  %v170_v5 = vld [vmem:[%s4856_s1 + $0x3e0] sm:$0xff] }
  0x25   :  { %856 = vmatmul.mubr.bf16.vlgmr.msra.gmra.mrb[0].mxu0 %v4033_v18  ;;  %897 = vmatmul.mubr.bf16.vlgmr.msra.gmra.mrb[0].mxu1 %v4033_v18 }
  0x26   :  { %906 = vmatpush1.bf16.msra.mxu0 %v3169_v21  ;;  %947 = vmatpush1.bf16.msra.mxu1 %v3171_v22  ;;  %v67_v21 = vld [vmem:[%s4856_s1 + $0xa8] sm:$0xff] }
  0x27   :  { %907 = vmatprep.subr.bf16.mxu0 %v3186_v23  ;;  %948 = vmatprep.subr.bf16.mxu1 %v3188_v24  ;;  %v75_v22 = vld [vmem:[%s4856_s1 + $0xe8] sm:$0xff]  ;;  %v3173_v23 = vcombine.low %v50_v10, %v58_v11  ;;  %v3175_v24 = vcombine.low %v51_v12, %v59_v13  ;;  %v3286_v10 = vcombine.high %v162_v4, %v170_v5  ;;  %v52_v12 = vld [vmem:[%s4856_s1 + $0x30] sm:$0xff] }
  0x28   :  { %937 = vmatprep.mubr.bf16.mxu0 %v3836_v3  ;;  %978 = vmatprep.mubr.bf16.mxu1 %v3836_v3  ;;  %v3192_v26 = vcombine.high %v67_v21, %v75_v22  ;;  %v60_v13 = vld [vmem:[%s4856_s1 + $0x70] sm:$0xff] }
  0x2a   :  { %908 = vmatpush1.bf16.msra.mxu0 %v3185_v29  ;;  %949 = vmatpush1.bf16.msra.mxu1 %v3187_v30  ;;  %v83_v29 = vld [vmem:[%s4856_s1 + $0x128] sm:$0xff] }
  0x2b   :  { %909 = vmatprep.subr.bf16.mxu0 %v3202_v31  ;;  %950 = vmatprep.subr.bf16.mxu1 %v3204_v32  ;;  %v91_v30 = vld [vmem:[%s4856_s1 + $0x168] sm:$0xff]  ;;  %v3189_v31 = vcombine.low %v66_v19, %v74_v20  ;;  %v3191_v32 = vcombine.low %v67_v21, %v75_v22  ;;  %v3178_v19 = vcombine.high %v52_v12, %v60_v13  ;;  %v68_v21 = vld [vmem:[%s4856_s1 + $0xb0] sm:$0xff] }
  0x2c   :  { %v3208_v34 = vcombine.high %v83_v29, %v91_v30  ;;  %v76_v22 = vld [vmem:[%s4856_s1 + $0xf0] sm:$0xff] }
  0x2e   :  { %910 = vmatpush1.bf16.msra.mxu0 %v3201_v37  ;;  %951 = vmatpush1.bf16.msra.mxu1 %v3203_v38  ;;  %v99_v37 = vld [vmem:[%s4856_s1 + $0x1a8] sm:$0xff] }
  0x2f   :  { %911 = vmatprep.subr.bf16.mxu0 %v3218_v39  ;;  %952 = vmatprep.subr.bf16.mxu1 %v3220_v40  ;;  %v107_v38 = vld [vmem:[%s4856_s1 + $0x1e8] sm:$0xff]  ;;  %v3205_v39 = vcombine.low %v82_v27, %v90_v28  ;;  %v3207_v40 = vcombine.low %v83_v29, %v91_v30  ;;  %v3194_v27 = vcombine.high %v68_v21, %v76_v22  ;;  %v84_v29 = vld [vmem:[%s4856_s1 + $0x130] sm:$0xff] }
  0x30   :  { %v3224_v42 = vcombine.high %v99_v37, %v107_v38  ;;  %v92_v30 = vld [vmem:[%s4856_s1 + $0x170] sm:$0xff] }
  0x32   :  { %912 = vmatpush1.bf16.msra.mxu0 %v3217_v45  ;;  %953 = vmatpush1.bf16.msra.mxu1 %v3219_v46  ;;  %v115_v45 = vld [vmem:[%s4856_s1 + $0x228] sm:$0xff] }
  0x33   :  { %913 = vmatprep.subr.bf16.mxu0 %v3234_v47  ;;  %954 = vmatprep.subr.bf16.mxu1 %v3236_v48  ;;  %v123_v46 = vld [vmem:[%s4856_s1 + $0x268] sm:$0xff]  ;;  %v3221_v47 = vcombine.low %v98_v35, %v106_v36  ;;  %v3223_v48 = vcombine.low %v99_v37, %v107_v38  ;;  %v3210_v35 = vcombine.high %v84_v29, %v92_v30  ;;  %v100_v37 = vld [vmem:[%s4856_s1 + $0x1b0] sm:$0xff] }
  0x34   :  { %v3240_v50 = vcombine.high %v115_v45, %v123_v46  ;;  %v108_v38 = vld [vmem:[%s4856_s1 + $0x1f0] sm:$0xff] }
  0x36   :  { %914 = vmatpush1.bf16.msra.mxu0 %v3233_v53  ;;  %955 = vmatpush1.bf16.msra.mxu1 %v3235_v54  ;;  %v131_v53 = vld [vmem:[%s4856_s1 + $0x2a8] sm:$0xff] }
  0x37   :  { %915 = vmatprep.subr.bf16.mxu0 %v3250_v55  ;;  %956 = vmatprep.subr.bf16.mxu1 %v3252_v56  ;;  %v139_v54 = vld [vmem:[%s4856_s1 + $0x2e8] sm:$0xff]  ;;  %v3237_v55 = vcombine.low %v114_v43, %v122_v44  ;;  %v3239_v56 = vcombine.low %v115_v45, %v123_v46  ;;  %v3226_v43 = vcombine.high %v100_v37, %v108_v38  ;;  %v116_v45 = vld [vmem:[%s4856_s1 + $0x230] sm:$0xff] }
  0x38   :  { %v3256_v58 = vcombine.high %v131_v53, %v139_v54  ;;  %v124_v46 = vld [vmem:[%s4856_s1 + $0x270] sm:$0xff] }
  0x3a   :  { %916 = vmatpush1.bf16.msra.mxu0 %v3249_v61  ;;  %957 = vmatpush1.bf16.msra.mxu1 %v3251_v62  ;;  %v147_v61 = vld [vmem:[%s4856_s1 + $0x328] sm:$0xff] }
  0x3b   :  { %917 = vmatprep.subr.bf16.mxu0 %v3266_v63  ;;  %958 = vmatprep.subr.bf16.mxu1 %v3268_v0  ;;  %v155_v62 = vld [vmem:[%s4856_s1 + $0x368] sm:$0xff]  ;;  %v3253_v63 = vcombine.low %v130_v51, %v138_v52  ;;  %v3255_v0 = vcombine.low %v131_v53, %v139_v54  ;;  %v132_v52 = vld [vmem:[%s4856_s1 + $0x2b0] sm:$0xff]  ;;  %v133_v54 = vld [vmem:[%s4856_s1 + $0x2b8] sm:$0xff] }
  0x3c   :  { %v3272_v2 = vcombine.high %v147_v61, %v155_v62  ;;  %v140_v53 = vld [vmem:[%s4856_s1 + $0x2f0] sm:$0xff] }
  0x3e   :  { %918 = vmatpush1.bf16.msra.mxu0 %v3265_v6  ;;  %959 = vmatpush1.bf16.msra.mxu1 %v3267_v7  ;;  %v163_v6 = vld [vmem:[%s4856_s1 + $0x3a8] sm:$0xff] }
  0x3f   :  { %919 = vmatprep.subr.bf16.mxu0 %v3282_v8  ;;  %960 = vmatprep.subr.bf16.mxu1 %v3284_v9  ;;  %v171_v7 = vld [vmem:[%s4856_s1 + $0x3e8] sm:$0xff]  ;;  %v3269_v8 = vcombine.low %v146_v59, %v154_v60  ;;  %v3271_v9 = vcombine.low %v147_v61, %v155_v62  ;;  %v148_v60 = vld [vmem:[%s4856_s1 + $0x330] sm:$0xff]  ;;  %v149_v62 = vld [vmem:[%s4856_s1 + $0x338] sm:$0xff] }
  0x40   :  { %v3288_v11 = vcombine.high %v163_v6, %v171_v7  ;;  %v156_v61 = vld [vmem:[%s4856_s1 + $0x370] sm:$0xff] }
  0x42   :  { %920 = vmatpush1.bf16.msra.mxu0 %v3281_v14  ;;  %961 = vmatpush1.bf16.msra.mxu1 %v3283_v15  ;;  %v53_v14 = vld [vmem:[%s4856_s1 + $0x38] sm:$0xff] }
  0x43   :  { %987 = vmatprep.subr.bf16.mxu0 %v3174_v16  ;;  %1028 = vmatprep.subr.bf16.mxu1 %v3176_v17  ;;  %v61_v15 = vld [vmem:[%s4856_s1 + $0x78] sm:$0xff]  ;;  %v3285_v16 = vcombine.low %v162_v4, %v170_v5  ;;  %v3287_v17 = vcombine.low %v163_v6, %v171_v7  ;;  %v164_v5 = vld [vmem:[%s4856_s1 + $0x3b0] sm:$0xff] }
  0x44   :  { %v3180_v20 = vcombine.high %v53_v14, %v61_v15  ;;  %v172_v6 = vld [vmem:[%s4856_s1 + $0x3f0] sm:$0xff]  ;;  %v165_v7 = vld [vmem:[%s4856_s1 + $0x3b8] sm:$0xff] }
  0x45   :  { %938 = vmatmul.mubr.bf16.vlgmr.msra.gmra.mrb[4].mxu0 %v4033_v18  ;;  %979 = vmatmul.mubr.bf16.vlgmr.msra.gmra.mrb[4].mxu1 %v4033_v18 }
  0x46   :  { %988 = vmatpush1.bf16.msra.mxu0 %v3173_v23  ;;  %1029 = vmatpush1.bf16.msra.mxu1 %v3175_v24  ;;  %v69_v23 = vld [vmem:[%s4856_s1 + $0xb8] sm:$0xff] }
  0x47   :  { %989 = vmatprep.subr.bf16.mxu0 %v3190_v25  ;;  %1030 = vmatprep.subr.bf16.mxu1 %v3192_v26  ;;  %v77_v24 = vld [vmem:[%s4856_s1 + $0xf8] sm:$0xff]  ;;  %v3177_v25 = vcombine.low %v52_v12, %v60_v13  ;;  %v3179_v26 = vcombine.low %v53_v14, %v61_v15  ;;  %v3289_v13 = vcombine.low %v164_v5, %v172_v6  ;;  %v1174_v15 = vlaneseq }
  0x48   :  { %1019 = vmatprep.mubr.bf16.mxu0 %v3836_v3  ;;  %1060 = vmatprep.mubr.bf16.mxu1 %v3836_v3  ;;  %v3196_v28 = vcombine.high %v69_v23, %v77_v24 }
  0x4a   :  { %990 = vmatpush1.bf16.msra.mxu0 %v3189_v31  ;;  %1031 = vmatpush1.bf16.msra.mxu1 %v3191_v32  ;;  %v85_v31 = vld [vmem:[%s4856_s1 + $0x138] sm:$0xff] }
  0x4b   :  { %991 = vmatprep.subr.bf16.mxu0 %v3206_v33  ;;  %1032 = vmatprep.subr.bf16.mxu1 %v3208_v34  ;;  %v93_v32 = vld [vmem:[%s4856_s1 + $0x178] sm:$0xff]  ;;  %v3193_v33 = vcombine.low %v68_v21, %v76_v22  ;;  %v3195_v34 = vcombine.low %v69_v23, %v77_v24 }
  0x4c   :  { %v3212_v36 = vcombine.high %v85_v31, %v93_v32 }
  0x4e   :  { %992 = vmatpush1.bf16.msra.mxu0 %v3205_v39  ;;  %1033 = vmatpush1.bf16.msra.mxu1 %v3207_v40  ;;  %v101_v39 = vld [vmem:[%s4856_s1 + $0x1b8] sm:$0xff] }
  0x4f   :  { %993 = vmatprep.subr.bf16.mxu0 %v3222_v41  ;;  %1034 = vmatprep.subr.bf16.mxu1 %v3224_v42  ;;  %v109_v40 = vld [vmem:[%s4856_s1 + $0x1f8] sm:$0xff]  ;;  %v3209_v41 = vcombine.low %v84_v29, %v92_v30  ;;  %v3211_v42 = vcombine.low %v85_v31, %v93_v32 }
  0x50   :  { %v3228_v44 = vcombine.high %v101_v39, %v109_v40 }
  0x52   :  { %994 = vmatpush1.bf16.msra.mxu0 %v3221_v47  ;;  %1035 = vmatpush1.bf16.msra.mxu1 %v3223_v48  ;;  %v125_v47 = vld [vmem:[%s4856_s1 + $0x278] sm:$0xff]  ;;  %v3225_v48 = vcombine.low %v100_v37, %v108_v38 }
  0x53   :  { %995 = vmatprep.subr.bf16.mxu0 %v3238_v49  ;;  %1036 = vmatprep.subr.bf16.mxu1 %v3240_v50  ;;  %v3227_v49 = vcombine.low %v101_v39, %v109_v40  ;;  %v3242_v50 = vcombine.high %v116_v45, %v124_v46 }
  0x56   :  { %996 = vmatpush1.bf16.msra.mxu0 %v3237_v55  ;;  %1037 = vmatpush1.bf16.msra.mxu1 %v3239_v56  ;;  %v141_v55 = vld [vmem:[%s4856_s1 + $0x2f8] sm:$0xff]  ;;  %v3241_v56 = vcombine.low %v116_v45, %v124_v46 }
  0x57   :  { %997 = vmatprep.subr.bf16.mxu0 %v3254_v57  ;;  %1038 = vmatprep.subr.bf16.mxu1 %v3256_v58  ;;  %v3258_v58 = vcombine.high %v132_v52, %v140_v53  ;;  %v3260_v59 = vcombine.high %v133_v54, %v141_v55 }
  0x5a   :  { %998 = vmatpush1.bf16.msra.mxu0 %v3253_v63  ;;  %1039 = vmatpush1.bf16.msra.mxu1 %v3255_v0  ;;  %v157_v63 = vld [vmem:[%s4856_s1 + $0x378] sm:$0xff]  ;;  %v3257_v0 = vcombine.low %v132_v52, %v140_v53  ;;  %v3293_v53 = vld [vmem:[%s4859_s2] ss:$0 sm:$0xff] }
  0x5b   :  { %999 = vmatprep.subr.bf16.mxu0 %v3270_v1  ;;  %1040 = vmatprep.subr.bf16.mxu1 %v3272_v2  ;;  %v3259_v1 = vcombine.low %v133_v54, %v141_v55  ;;  %v3274_v2 = vcombine.high %v148_v60, %v156_v61  ;;  %v3276_v4 = vcombine.high %v149_v62, %v157_v63 }
  0x5e   :  { %1000 = vmatpush1.bf16.msra.mxu0 %v3269_v8  ;;  %1041 = vmatpush1.bf16.msra.mxu1 %v3271_v9  ;;  %v173_v8 = vld [vmem:[%s4856_s1 + $0x3f8] sm:$0xff]  ;;  %v3273_v9 = vcombine.low %v148_v60, %v156_v61 }
  0x5f   :  { %1001 = vmatprep.subr.bf16.mxu0 %v3286_v10  ;;  %1042 = vmatprep.subr.bf16.mxu1 %v3288_v11  ;;  %v3275_v10 = vcombine.low %v149_v62, %v157_v63  ;;  %v3290_v11 = vcombine.high %v164_v5, %v172_v6  ;;  %v3292_v12 = vcombine.high %v165_v7, %v173_v8 }
  0x60   :  { %v3291_v14 = vcombine.low %v165_v7, %v173_v8 }
  0x62   :  { %1002 = vmatpush1.bf16.msra.mxu0 %v3285_v16  ;;  %1043 = vmatpush1.bf16.msra.mxu1 %v3287_v17  ;;  %v3744_v16 = vld [vmem:[%s4858_s4] sm:$0xff]   ;;  %v3837_v17 = vmov 1966171168  }
  0x63   :  { %1069 = vmatprep.subr.bf16.mxu0 %v3178_v19  ;;  %1110 = vmatprep.subr.bf16.mxu1 %v3180_v20  ;;  %v1172_v19 = vunpack.c.l.s4 %v3837_v17  ;;  %v1175_v20 = vshrl.u32 %v1174_v15, 7 }
  0x65   :  { %1020 = vmatmul.mubr.bf16.vlgmr.msra.gmra.mrb[8].mxu0 %v4033_v18  ;;  %1061 = vmatmul.mubr.bf16.vlgmr.msra.gmra.mrb[8].mxu1 %v4033_v18  ;;  %v1173_v21 = vunpack.c.0.s8 %v1172_v19 }
  0x66   :  { %1070 = vmatpush1.bf16.msra.mxu0 %v3177_v25  ;;  %1111 = vmatpush1.bf16.msra.mxu1 %v3179_v26 }
  0x67   :  { %1071 = vmatprep.subr.bf16.mxu0 %v3194_v27  ;;  %1112 = vmatprep.subr.bf16.mxu1 %v3196_v28  ;;  %v4322_v23 = vsub.s32 %v1173_v21, %v1175_v20 }
  0x68   :  { %1101 = vmatprep.mubr.bf16.mxu0 %v3836_v3  ;;  %1142 = vmatprep.mubr.bf16.mxu1 %v3836_v3  ;;  %v117_v3 = vld [vmem:[%s4856_s1 + $0x238] sm:$0xff] }
  0x69   :  { %v3244_v51 = vcombine.high %v117_v3, %v125_v47  ;;  %v3243_v57 = vcombine.low %v117_v3, %v125_v47 }
  0x6a   :  { %1072 = vmatpush1.bf16.msra.mxu0 %v3193_v33  ;;  %1113 = vmatpush1.bf16.msra.mxu1 %v3195_v34 }
  0x6b   :  { %1073 = vmatprep.subr.bf16.mxu0 %v3210_v35  ;;  %1114 = vmatprep.subr.bf16.mxu1 %v3212_v36 }
  0x6e   :  { %1074 = vmatpush1.bf16.msra.mxu0 %v3209_v41  ;;  %1115 = vmatpush1.bf16.msra.mxu1 %v3211_v42 }
  0x6f   :  { %1075 = vmatprep.subr.bf16.mxu0 %v3226_v43  ;;  %1116 = vmatprep.subr.bf16.mxu1 %v3228_v44 }
  0x72   :  { %1076 = vmatpush1.bf16.msra.mxu0 %v3225_v48  ;;  %1117 = vmatpush1.bf16.msra.mxu1 %v3227_v49 }
  0x73   :  { %1077 = vmatprep.subr.bf16.mxu0 %v3242_v50  ;;  %1118 = vmatprep.subr.bf16.mxu1 %v3244_v51 }
  0x76   :  { %1078 = vmatpush1.bf16.msra.mxu0 %v3241_v56  ;;  %1119 = vmatpush1.bf16.msra.mxu1 %v3243_v57  ;;  %v1305_v56 = vld [vmem:[%s4860_s3 + $0x10] sm:$0xff] }
  0x77   :  { %1079 = vmatprep.subr.bf16.mxu0 %v3258_v58  ;;  %1120 = vmatprep.subr.bf16.mxu1 %v3260_v59 }
  0x7a   :  { %1080 = vmatpush1.bf16.msra.mxu0 %v3257_v0  ;;  %1121 = vmatpush1.bf16.msra.mxu1 %v3259_v1 }
  0x7b   :  { %1081 = vmatprep.subr.bf16.mxu0 %v3274_v2  ;;  %1122 = vmatprep.subr.bf16.mxu1 %v3276_v4 }
  0x7e   :  { %1082 = vmatpush1.bf16.msra.mxu0 %v3273_v9  ;;  %1123 = vmatpush1.bf16.msra.mxu1 %v3275_v10 }
  0x7f   :  { %1083 = vmatprep.subr.bf16.mxu0 %v3290_v11  ;;  %1124 = vmatprep.subr.bf16.mxu1 %v3292_v12 }
  0x82   :  { %1084 = vmatpush1.bf16.msra.mxu0 %v3289_v13  ;;  %1125 = vmatpush1.bf16.msra.mxu1 %v3291_v14 }
  0x85   :  { %1102 = vmatmul.mubr.bf16.vlgmr.msra.gmra.mrb[12].mxu0 %v4033_v18  ;;  %1143 = vmatmul.mubr.bf16.vlgmr.msra.gmra.mrb[12].mxu1 %v4033_v18 }
  0x86   :  { %3482 = vmatprep.mubr.bf16.mxu0 %v3744_v16 }
  0xf8   :  { %v857_v22 = vpop.f32.mrb[0].mxu0  ;;  %v898_v24 = vpop.f32.mrb[0].mxu1 }
  0xf9   :  { %v859_v25 = vpop.f32.mrb[1].mxu0  ;;  %v900_v27 = vpop.f32.mrb[1].mxu1 }
  0xfa   :  { %v1167_v26 = vcombine.low %v857_v22, %v859_v25  ;;  %v861_v28 = vpop.f32.mrb[2].mxu0  ;;  %v1168_v29 = vcombine.low %v898_v24, %v900_v27  ;;  %v902_v18 = vpop.f32.mrb[2].mxu1 }
  0xfb   :  { %v862_v30 = vpop.f32.mrb[3].mxu0  ;;  %v903_v32 = vpop.f32.mrb[3].mxu1 }
  0xfc   :  { %v1177_v31 = vrot.slane %v1167_v26, %v4322_v23  ;;  %v1184_v33 = vrot.slane %v1168_v29, %v4322_v23  ;;  %v1303_v30 = vld [vmem:[%s4860_s3] sm:$0xff] }
  0xfe   :  { %v1199_v34 = vcombine.low %v1177_v31, %v1184_v33  ;;  %v1200_v35 = vcombine.high %v1177_v31, %v1184_v33  ;;  %v1304_v33 = vld [vmem:[%s4860_s3 + $0x8] sm:$0xff] }
 0x100   :  { %v1209_v49 = vrot.slane %v1199_v34, %v4322_v23  ;;  %v1216_v50 = vrot.slane %v1200_v35, %v4322_v23  ;;  %v1306_v34 = vld [vmem:[%s4860_s3 + $0x18] sm:$0xff] }
 0x118   :  { %v939_v36 = vpop.f32.mrb[4].mxu0  ;;  %v980_v37 = vpop.f32.mrb[4].mxu1 }
 0x119   :  { %v941_v38 = vpop.f32.mrb[5].mxu0  ;;  %v982_v40 = vpop.f32.mrb[5].mxu1 }
 0x11a   :  { %v1169_v39 = vcombine.low %v939_v36, %v941_v38  ;;  %v943_v41 = vpop.f32.mrb[6].mxu0  ;;  %v1170_v42 = vcombine.low %v980_v37, %v982_v40  ;;  %v984_v43 = vpop.f32.mrb[6].mxu1 }
 0x11b   :  { %v944_v44 = vpop.f32.mrb[7].mxu0  ;;  %v985_v46 = vpop.f32.mrb[7].mxu1 }
 0x11c   :  { %v1191_v45 = vrot.slane %v1169_v39, %v4322_v23  ;;  %v1198_v3 = vrot.slane %v1170_v42, %v4322_v23  ;;  %v3746_v46 = vld [vmem:[%s4858_s4 + $0x10] sm:$0xff]  }
 0x11e   :  { %v1201_v47 = vcombine.low %v1191_v45, %v1198_v3  ;;  %v1202_v48 = vcombine.high %v1191_v45, %v1198_v3  ;;  %v3745_v45 = vld [vmem:[%s4858_s4 + $0x8] sm:$0xff]   ;;  %v3747_v3 = vld [vmem:[%s4858_s4 + $0x18] sm:$0xff]  }
 0x120   :  { %v1223_v51 = vrot.slane %v1201_v47, %v4322_v23  ;;  %v1230_v52 = vrot.slane %v1202_v48, %v4322_v23  ;;  %v3748_v47 = vld [vmem:[%s4858_s4 + $0x20] sm:$0xff]   ;;  %v3749_v48 = vld [vmem:[%s4858_s4 + $0x28] sm:$0xff]  }
 0x122   :  { %v1231_v54 = vcombine.low %v1209_v49, %v1223_v51  ;;  %v1232_v55 = vcombine.low %v1216_v50, %v1230_v52  ;;  %v3750_v49 = vld [vmem:[%s4858_s4 + $0x30] sm:$0xff]   ;;  %v3751_v50 = vld [vmem:[%s4858_s4 + $0x38] sm:$0xff]   ;;  %v3752_v51 = vld [vmem:[%s4858_s4 + $0x40] sm:$0xff]  }
 0x123   :  { %v3753_v52 = vld [vmem:[%s4858_s4 + $0x48] sm:$0xff]  }
 0x124   :  { %v1316_v57 = vadd.f32 %v3293_v53, %v1232_v55  ;;  %v1314_v26 = vadd.f32 %v3293_v53, %v1231_v54  ;;  %v3755_v54 = vld [vmem:[%s4858_s4 + $0x58] sm:$0xff]   ;;  %v3756_v55 = vld [vmem:[%s4858_s4 + $0x60] sm:$0xff]  }
 0x126   :  { %v1320_v58 = vadd.f32 %v1316_v57, %v1305_v56  ;;  %v1318_v36 = vadd.f32 %v1314_v26, %v1303_v30  ;;  %v3757_v56 = vld [vmem:[%s4858_s4 + $0x68] sm:$0xff]   ;;  %v3758_v57 = vld [vmem:[%s4858_s4 + $0x70] sm:$0xff]  }
 0x128   :  { %v1324_v41 = vmax.f32 %v1320_v58, 0.0  ;;  %v3759_v58 = vld [vmem:[%s4858_s4 + $0x78] sm:$0xff]  }
 0x138   :  { %v1021_v59 = vpop.f32.mrb[8].mxu0  ;;  %v1062_v60 = vpop.f32.mrb[8].mxu1 }
 0x139   :  { %v1023_v61 = vpop.f32.mrb[9].mxu0  ;;  %v1064_v63 = vpop.f32.mrb[9].mxu1 }
 0x13a   :  { %v1233_v62 = vcombine.low %v1021_v59, %v1023_v61  ;;  %v1025_v0 = vpop.f32.mrb[10].mxu0  ;;  %v1234_v1 = vcombine.low %v1062_v60, %v1064_v63  ;;  %v1066_v2 = vpop.f32.mrb[10].mxu1 }
 0x13b   :  { %v1026_v4 = vpop.f32.mrb[11].mxu0  ;;  %v1067_v6 = vpop.f32.mrb[11].mxu1 }
 0x13c   :  { %v1243_v5 = vrot.slane %v1233_v62, %v4322_v23  ;;  %v1250_v7 = vrot.slane %v1234_v1, %v4322_v23 }
 0x13e   :  { %v1265_v8 = vcombine.low %v1243_v5, %v1250_v7  ;;  %v1266_v9 = vcombine.high %v1243_v5, %v1250_v7 }
 0x140   :  { %v1275_v27 = vrot.slane %v1265_v8, %v4322_v23  ;;  %v1282_v28 = vrot.slane %v1266_v9, %v4322_v23 }
 0x158   :  { %v1103_v10 = vpop.f32.mrb[12].mxu0  ;;  %v1144_v11 = vpop.f32.mrb[12].mxu1 }
 0x159   :  { %v1105_v12 = vpop.f32.mrb[13].mxu0  ;;  %v1146_v14 = vpop.f32.mrb[13].mxu1 }
 0x15a   :  { %v1235_v13 = vcombine.low %v1103_v10, %v1105_v12  ;;  %v1107_v15 = vpop.f32.mrb[14].mxu0  ;;  %v1236_v16 = vcombine.low %v1144_v11, %v1146_v14  ;;  %v1148_v17 = vpop.f32.mrb[14].mxu1 }
 0x15b   :  { %v1108_v19 = vpop.f32.mrb[15].mxu0  ;;  %v1149_v21 = vpop.f32.mrb[15].mxu1  ;;  %v3761_v17 = vld [vmem:[%s4861_s5 + $0x8] sm:$0xff]  }
 0x15c   :  { %v1257_v20 = vrot.slane %v1235_v13, %v4322_v23  ;;  %v1264_v22 = vrot.slane %v1236_v16, %v4322_v23  ;;  %v3760_v16 = vld [vmem:[%s4861_s5] sm:$0xff]   ;;  %v3762_v21 = vld [vmem:[%s4861_s5 + $0x10] sm:$0xff]  }
 0x15d   :  { %3514 = vmatprep.subr.bf16.mxu1 %v3760_v16 }
 0x15e   :  { %v1267_v24 = vcombine.low %v1257_v20, %v1264_v22  ;;  %v1268_v25 = vcombine.high %v1257_v20, %v1264_v22  ;;  %3515 = vmatpush3.bf16.msra.mxu1 %v3760_v16 }
 0x15f   :  { %3516 = vmatprep.subr.bf16.mxu1 %v3761_v17 }
 0x160   :  { %v1289_v29 = vrot.slane %v1267_v24, %v4322_v23  ;;  %v1296_v18 = vrot.slane %v1268_v25, %v4322_v23  ;;  %v1322_v23 = vmax.f32 %v1318_v36, 0.0 }
 0x162   :  { %v1297_v31 = vcombine.low %v1275_v27, %v1289_v29  ;;  %v1298_v32 = vcombine.low %v1282_v28, %v1296_v18  ;;  %3517 = vmatpush3.bf16.msra.mxu1 %v3761_v17  ;;  %v3763_v29 = vld [vmem:[%s4861_s5 + $0x18] sm:$0xff]  }
 0x163   :  { %3518 = vmatprep.subr.bf16.mxu1 %v3762_v21 }
 0x164   :  { %v1315_v35 = vadd.f32 %v3293_v53, %v1297_v31  ;;  %v1317_v37 = vadd.f32 %v3293_v53, %v1298_v32  ;;  %v3754_v53 = vld [vmem:[%s4858_s4 + $0x50] sm:$0xff]  }
 0x166   :  { %v1319_v38 = vadd.f32 %v1315_v35, %v1304_v33  ;;  %v1321_v39 = vadd.f32 %v1317_v37, %v1306_v34  ;;  %3519 = vmatpush3.bf16.msra.mxu1 %v3762_v21 }
 0x167   :  { %3520 = vmatprep.subr.bf16.mxu1 %v3763_v29 }
 0x168   :  { %v1323_v40 = vmax.f32 %v1319_v38, 0.0  ;;  %v1325_v42 = vmax.f32 %v1321_v39, 0.0 }
 0x16a   :  { %v1326_v43 = vpack.c.bf16 %v1323_v40, %v1322_v23  ;;  %v4355_v44 = vpack.c.bf16 %v1325_v42, %v1324_v41  ;;  %3521 = vmatpush3.bf16.msra.mxu1 %v3763_v29 }
 0x16c   :  { %3480 = vmatprep.subr.bf16.mxu0 %v1326_v43 }
 0x16d   :  { %3481 = vmatpush3.bf16.xpose.msra.mxu0 %v1326_v43 }
 0x174   :  { %3483 = vmatmul.mubr.bf16.vlgmr.msra.gmra.mrb[16].mxu0 %v3745_v45  ;;  %v4445_v45 = vld [vmem:[%s4862_s6 + $0x8] sm:$0xff] }
 0x175   :  { %3486 = vmatprep.mubr.bf16.mxu0 %v3746_v46  ;;  %v4450_v46 = vld [vmem:[%s4862_s6] sm:$0xff] }
 0x17c   :  { %3487 = vmatmul.mubr.bf16.gmra.mrb[20].mxu0 %v3747_v3  ;;  %v4457_v3 = vld [vmem:[%s4862_s6 + $0x10] sm:$0xff] }
 0x17d   :  { %3490 = vmatprep.mubr.bf16.mxu0 %v3748_v47  ;;  %v4462_v47 = vld [vmem:[%s4862_s6 + $0x18] sm:$0xff] }
 0x184   :  { %3491 = vmatmul.mubr.bf16.gmra.mrb[24].mxu0 %v3749_v48  ;;  %v4469_v48 = vld [vmem:[%s4862_s6 + $0x20] sm:$0xff] }
 0x185   :  { %3494 = vmatprep.mubr.bf16.mxu0 %v3750_v49  ;;  %v4474_v49 = vld [vmem:[%s4862_s6 + $0x28] sm:$0xff] }
 0x18c   :  { %3495 = vmatmul.mubr.bf16.gmra.mrb[28].mxu0 %v3751_v50  ;;  %v4481_v50 = vld [vmem:[%s4862_s6 + $0x30] sm:$0xff] }
 0x18d   :  { %3498 = vmatprep.mubr.bf16.mxu0 %v3752_v51  ;;  %v4486_v51 = vld [vmem:[%s4862_s6 + $0x38] sm:$0xff] }
 0x194   :  { %3499 = vmatmul.mubr.bf16.gmra.mrb[32].mxu0 %v3753_v52 }
 0x195   :  { %3502 = vmatprep.mubr.bf16.mxu0 %v3754_v53 }
 0x19c   :  { %3503 = vmatmul.mubr.bf16.gmra.mrb[36].mxu0 %v3755_v54 }
 0x19d   :  { %3506 = vmatprep.mubr.bf16.mxu0 %v3756_v55 }
 0x1a4   :  { %3507 = vmatmul.mubr.bf16.gmra.mrb[40].mxu0 %v3757_v56 }
 0x1a5   :  { %3510 = vmatprep.mubr.bf16.mxu0 %v3758_v57 }
 0x1ac   :  { %3511 = vmatmul.mubr.bf16.gmra.mrb[44].mxu0 %v3759_v58 }
 0x247   :  { %v4402_v59 = vpop.f32.mrb[16].mxu0 }
 0x248   :  { %v4404_v60 = vpop.f32.mrb[17].mxu0 }
 0x249   :  { %v4406_v61 = vpop.f32.mrb[18].mxu0 }
 0x24a   :  { %v4408_v62 = vpop.f32.mrb[19].mxu0 }
 0x24f   :  { %v4410_v63 = vpop.f32.mrb[20].mxu0 }
 0x250   :  { %v4412_v0 = vpop.f32.mrb[21].mxu0 }
 0x251   :  { %v4414_v1 = vpop.f32.mrb[22].mxu0 }
 0x252   :  { %v4416_v2 = vpop.f32.mrb[23].mxu0 }
 0x257   :  { %v3492_v4 = vpop.f32.mrb[24].mxu0 }
 0x258   :  { %v1522_v5 = vpop.f32.mrb[25].mxu0 }
 0x259   :  { %v3493_v6 = vpop.f32.mrb[26].mxu0 }
 0x25a   :  { %v3612_v7 = vpack.i.bf16 %v3493_v6, %v3492_v4  ;;  %v1525_v8 = vpop.f32.mrb[27].mxu0 }
 0x25b   :  { %v3617_v9 = vpack.i.bf16 %v1525_v8, %v1522_v5 }
 0x25c   :  { %3613 = vrot.lane.b32.xlu0 %v3612_v7, %s3838_s16 }
 0x25f   :  { %v3496_v10 = vpop.f32.mrb[28].mxu0 }
 0x260   :  { %3618 = vrot.lane.b32.xlu0 %v3617_v9, %s3838_s16  ;;  %v1538_v11 = vpop.f32.mrb[29].mxu0 }
 0x261   :  { %v3497_v12 = vpop.f32.mrb[30].mxu0 }
 0x262   :  { %v3622_v13 = vpack.i.bf16 %v3497_v12, %v3496_v10  ;;  %v1541_v14 = vpop.f32.mrb[31].mxu0 }
 0x263   :  { %v3627_v15 = vpack.i.bf16 %v1541_v14, %v1538_v11 }
 0x264   :  { %3623 = vrot.lane.b32.xlu1 %v3622_v13, %s3838_s16 }
 0x265   :  { %3628 = vrot.lane.b32.xlu0 %v3627_v15, %s3838_s16 }
 0x267   :  { %v3500_v19 = vpop.f32.mrb[32].mxu0 }
 0x268   :  { %v1554_v20 = vpop.f32.mrb[33].mxu0 }
 0x269   :  { %v3501_v22 = vpop.f32.mrb[34].mxu0 }
 0x26a   :  { %v3632_v24 = vpack.i.bf16 %v3501_v22, %v3500_v19  ;;  %v1557_v25 = vpop.f32.mrb[35].mxu0 }
 0x26b   :  { %v3637_v26 = vpack.i.bf16 %v1557_v25, %v1554_v20 }
 0x26c   :  { %3633 = vrot.lane.b32.xlu1 %v3632_v24, %s3839_s22 }
 0x26f   :  { %v3504_v27 = vpop.f32.mrb[36].mxu0 }
 0x270   :  { %3638 = vrot.lane.b32.xlu1 %v3637_v26, %s3839_s22  ;;  %v1570_v28 = vpop.f32.mrb[37].mxu0 }
 0x271   :  { %v3505_v18 = vpop.f32.mrb[38].mxu0 }
 0x272   :  { %v3657_v30 = vpack.i.bf16 %v3505_v18, %v3504_v27  ;;  %v1573_v31 = vpop.f32.mrb[39].mxu0 }
 0x273   :  { %v3652_v32 = vpack.i.bf16 %v1573_v31, %v1570_v28 }
 0x277   :  { %v3508_v33 = vpop.f32.mrb[40].mxu0 }
 0x278   :  { %v1586_v34 = vpop.f32.mrb[41].mxu0 }
 0x279   :  { %v3509_v35 = vpop.f32.mrb[42].mxu0 }
 0x27a   :  { %v3642_v36 = vpack.i.bf16 %v3509_v35, %v3508_v33  ;;  %v1589_v37 = vpop.f32.mrb[43].mxu0 }
 0x27b   :  { %v3647_v38 = vpack.i.bf16 %v1589_v37, %v1586_v34 }
 0x27c   :  { %3643 = vrot.lane.b32.xlu1 %v3642_v36, %s3840_s24 }
 0x27d   :  { %3648 = vrot.lane.b32.xlu0 %v3647_v38, %s3840_s24 }
 0x27f   :  { %v3512_v39 = vpop.f32.mrb[44].mxu0 }
 0x280   :  { %3658 = vrot.lane.b32.xlu1 %v3657_v30, %s3839_s22  ;;  %v1602_v23 = vpop.f32.mrb[45].mxu0 }
 0x281   :  { %3653 = vrot.lane.b32.xlu0 %v3652_v32, %s3839_s22  ;;  %v3513_v40 = vpop.f32.mrb[46].mxu0 }
 0x282   :  { %v3667_v41 = vpack.i.bf16 %v3513_v40, %v3512_v39  ;;  %v1605_v42 = vpop.f32.mrb[47].mxu0 }
 0x283   :  { %v3662_v43 = vpack.i.bf16 %v1605_v42, %v1602_v23 }
 0x284   :  { %3668 = vrot.lane.b32.xlu1 %v3667_v41, %s3840_s24 }
 0x285   :  { %3663 = vrot.lane.b32.xlu0 %v3662_v43, %s3840_s24 }
 0x288   :  { %1767 = vperm.xlu1 %3673, %v4445_v45  }
 0x289   :  { %1762 = vperm.xlu0 %3672, %v4450_v46  }
 0x28c   :  { %1772 = vperm.xlu1 %3673, %v4457_v3  }
 0x28d   :  { %1777 = vperm.xlu0 %3672, %v4462_v47  }
 0x290   :  { %1782 = vperm.xlu1 %3673, %v4469_v48  }
 0x291   :  { %1787 = vperm.xlu0 %3672, %v4474_v49  }
 0x294   :  { %1792 = vperm.xlu1 %3673, %v4481_v50  }
 0x295   :  { %1797 = vperm.xlu0 %3672, %v4486_v51  }
 0x2ce   :  { %v3614_v52 = vpop.permute.xlu0 %3613 }
 0x2cf   :  { %v3616_v56 = vunpack.i.h.bf16 %v3614_v52  ;;  %v3615_v57 = vunpack.i.l.bf16 %v3614_v52 }
 0x2d1   :  { %v1717_v11 = vsel %vm1713_vm1, %v4406_v61, %v3616_v56  ;;  %v1716_v12 = vsel %vm1713_vm1, %v4402_v59, %v3615_v57 }
 0x2d2   :  { %v3619_v55 = vpop.permute.xlu0 %3618 }
 0x2d3   :  { %v3621_v58 = vunpack.i.h.bf16 %v3619_v55  ;;  %v3620_v5 = vunpack.i.l.bf16 %v3619_v55 }
 0x2d5   :  { %v1715_v13 = vsel %vm1713_vm1, %v4408_v62, %v3621_v58  ;;  %v1714_v15 = vsel %vm1713_vm1, %v4404_v60, %v3620_v5 }
 0x2d6   :  { %v3624_v53 = vpop.permute.xlu1 %3623 }
 0x2d7   :  { %v3629_v6 = vpop.permute.xlu0 %3628  ;;  %v3626_v16 = vunpack.i.h.bf16 %v3624_v53  ;;  %v3625_v27 = vunpack.i.l.bf16 %v3624_v53 }
 0x2d8   :  { %v3631_v30 = vunpack.i.h.bf16 %v3629_v6  ;;  %v3630_v31 = vunpack.i.l.bf16 %v3629_v6  ;;  %v3841_v6 = vmov 0.0  }
 0x2d9   :  { %v1721_v38 = vsel %vm1713_vm1, %v4414_v1, %v3626_v16  ;;  %v1720_v39 = vsel %vm1713_vm1, %v4410_v63, %v3625_v27  ;;  %3530 = vmatprep.subr.bf16.mxu1 %v3841_v6 }
 0x2da   :  { %v1719_v40 = vsel %vm1713_vm1, %v4416_v2, %v3631_v30  ;;  %v1718_v41 = vsel %vm1713_vm1, %v4412_v0, %v3630_v31 }
 0x2de   :  { %v3634_v54 = vpop.permute.xlu1 %3633 }
 0x2df   :  { %v3636_v7 = vunpack.i.h.bf16 %v3634_v54  ;;  %v3635_v8 = vunpack.i.l.bf16 %v3634_v54 }
 0x2e1   :  { %v1726_v21 = vsel %vm1722_vm2, %v1717_v11, %v3636_v7  ;;  %v1725_v22 = vsel %vm1722_vm2, %v1716_v12, %v3635_v8  ;;  %v1904_v12 = vld [vmem:[%s4864_s7 + $0x10] sm:$0xff] }
 0x2e2   :  { %v3639_v4 = vpop.permute.xlu1 %3638 }
 0x2e3   :  { %v3641_v9 = vunpack.i.h.bf16 %v3639_v4  ;;  %v3640_v10 = vunpack.i.l.bf16 %v3639_v4 }
 0x2e5   :  { %v1724_v59 = vsel %vm1722_vm2, %v1715_v13, %v3641_v9  ;;  %v1723_v25 = vsel %vm1722_vm2, %v1714_v15, %v3640_v10  ;;  %v1902_v15 = vld [vmem:[%s4864_s7] sm:$0xff] }
 0x2ee   :  { %v3644_v14 = vpop.permute.xlu1 %3643 }
 0x2ef   :  { %v3646_v17 = vunpack.i.h.bf16 %v3644_v14  ;;  %v3645_v19 = vunpack.i.l.bf16 %v3644_v14  ;;  %v3649_v20 = vpop.permute.xlu0 %3648 }
 0x2f0   :  { %v3651_v61 = vunpack.i.h.bf16 %v3649_v20  ;;  %v3650_v24 = vunpack.i.l.bf16 %v3649_v20  ;;  %v1905_v20 = vld [vmem:[%s4864_s7 + $0x18] sm:$0xff] }
 0x2f1   :  { %v1735_v62 = vsel %vm1731_vm3, %v1726_v21, %v3646_v17  ;;  %v1734_v26 = vsel %vm1731_vm3, %v1725_v22, %v3645_v19 }
 0x2f2   :  { %v1741_v60 = vpack.c.bf16 %v1735_v62, %v1734_v26  ;;  %v1733_v28 = vsel %vm1731_vm3, %v1724_v59, %v3651_v61  ;;  %v1732_v29 = vsel %vm1731_vm3, %v1723_v25, %v3650_v24  ;;  %v3659_v18 = vpop.permute.xlu1 %3658  ;;  %v1903_v24 = vld [vmem:[%s4864_s7 + $0x8] sm:$0xff] }
 0x2f3   :  { %v1740_v32 = vpack.c.bf16 %v1733_v28, %v1732_v29  ;;  %v3654_v33 = vpop.permute.xlu0 %3653  ;;  %v3661_v34 = vunpack.i.h.bf16 %v3659_v18  ;;  %v3660_v35 = vunpack.i.l.bf16 %v3659_v18 }
 0x2f4   :  { %v3656_v36 = vunpack.i.h.bf16 %v3654_v33  ;;  %v3655_v37 = vunpack.i.l.bf16 %v3654_v33 }
 0x2f5   :  { %3522 = vmatprep.mubr.msk.bf16.mxu1 %vm1824_vm4, %v1740_v32  ;;  %v1730_v53 = vsel %vm1722_vm2, %v1721_v38, %v3661_v34  ;;  %v1729_v54 = vsel %vm1722_vm2, %v1720_v39, %v3660_v35  ;;  %v1908_v32 = vld [vmem:[%s4864_s7 + $0x30] sm:$0xff] }
 0x2f6   :  { %3523 = vmatmul.mubr.msk.bf16.vlgmr.msra.gmra.mrb[16].mxu1 %vm1824_vm4, %v1741_v60  ;;  %v3669_v23 = vpop.permute.xlu1 %3668  ;;  %v1728_v63 = vsel %vm1722_vm2, %v1719_v40, %v3656_v36  ;;  %v1727_v56 = vsel %vm1722_vm2, %v1718_v41, %v3655_v37  ;;  %v1906_v36 = vld [vmem:[%s4864_s7 + $0x20] sm:$0xff]  ;;  %v1909_v40 = vld [vmem:[%s4864_s7 + $0x38] sm:$0xff] }
 0x2f7   :  { %v3671_v42 = vunpack.i.h.bf16 %v3669_v23  ;;  %v3670_v43 = vunpack.i.l.bf16 %v3669_v23  ;;  %v3664_v52 = vpop.permute.xlu0 %3663 }
 0x2f8   :  { %v3666_v1 = vunpack.i.h.bf16 %v3664_v52  ;;  %v3665_v55 = vunpack.i.l.bf16 %v3664_v52  ;;  %v1907_v52 = vld [vmem:[%s4864_s7 + $0x28] sm:$0xff] }
 0x2f9   :  { %v1739_v57 = vsel %vm1731_vm3, %v1730_v53, %v3671_v42  ;;  %v1738_v2 = vsel %vm1731_vm3, %v1729_v54, %v3670_v43 }
 0x2fa   :  { %v1743_v58 = vpack.c.bf16 %v1739_v57, %v1738_v2  ;;  %v1737_v0 = vsel %vm1731_vm3, %v1728_v63, %v3666_v1  ;;  %v1736_v4 = vsel %vm1731_vm3, %v1727_v56, %v3665_v55 }
 0x2fb   :  { %v1742_v5 = vpack.c.bf16 %v1737_v0, %v1736_v4  ;;  %v3764_v4 = vld [vmem:[%s4863_s8] sm:$0xff]  }
 0x2fd   :  { %3526 = vmatprep.mubr.msk.bf16.mxu1 %vm1824_vm4, %v1742_v5  ;;  %v3765_v5 = vld [vmem:[%s4858_s4] sm:$0xff]  }
 0x2fe   :  { %3527 = vmatmul.mubr.msk.bf16.gmra.mrb[20].mxu1 %vm1824_vm4, %v1743_v58 }
 0x2ff   :  { %3538 = vmatprep.mubr.msk.bf16.mxu1 %vm3842_vm5, %v3841_v6 }
 0x307   :  { %v1768_v7 = vpop.permute.xlu1 %1767 }
 0x308   :  { %v1763_v8 = vpop.permute.xlu0 %1762 }
 0x30b   :  { %v1773_v9 = vpop.permute.xlu1 %1772 }
 0x30c   :  { %v1778_v10 = vpop.permute.xlu0 %1777 }
 0x30f   :  { %v1783_v16 = vpop.permute.xlu1 %1782 }
 0x310   :  { %v1788_v59 = vpop.permute.xlu0 %1787 }
 0x313   :  { %v1793_v30 = vpop.permute.xlu1 %1792 }
 0x314   :  { %v1798_v38 = vpop.permute.xlu0 %1797 }
 0x3c9   :  { %v3524_v11 = vpop.f32.mrb[16].mxu1 }
 0x3ca   :  { %v1880_v13 = vadd.f32 %v3524_v11, %v1773_v9  ;;  %v1871_v14 = vpop.f32.mrb[17].mxu1  ;;  %v3768_v9 = vld [vmem:[%s4858_s4 + $0x18] sm:$0xff]   ;;  %v3771_v11 = vld [vmem:[%s4858_s4 + $0x30] sm:$0xff]  }
 0x3cb   :  { %v1872_v17 = vadd.f32 %v1871_v14, %v1763_v8  ;;  %v3525_v19 = vpop.f32.mrb[18].mxu1  ;;  %v3767_v8 = vld [vmem:[%s4858_s4 + $0x10] sm:$0xff]   ;;  %v3774_v14 = vld [vmem:[%s4858_s4 + $0x48] sm:$0xff]  }
 0x3cc   :  { %v1912_v21 = vadd.f32 %v1904_v12, %v1880_v13  ;;  %v1883_v22 = vadd.f32 %v3525_v19, %v1778_v10  ;;  %v1874_v61 = vpop.f32.mrb[19].mxu1  ;;  %v3769_v10 = vld [vmem:[%s4858_s4 + $0x20] sm:$0xff]   ;;  %v3772_v12 = vld [vmem:[%s4858_s4 + $0x38] sm:$0xff]   ;;  %v3778_v19 = vld [vmem:[%s4858_s4 + $0x68] sm:$0xff]  }
 0x3cd   :  { %v1910_v25 = vadd.f32 %v1902_v15, %v1872_v17  ;;  %v1875_v62 = vadd.f32 %v1874_v61, %v1768_v7  ;;  %v3766_v7 = vld [vmem:[%s4858_s4 + $0x8] sm:$0xff]   ;;  %v3773_v13 = vld [vmem:[%s4858_s4 + $0x40] sm:$0xff]   ;;  %v3775_v15 = vld [vmem:[%s4858_s4 + $0x50] sm:$0xff]  }
 0x3ce   :  { %v1913_v26 = vadd.f32 %v1905_v20, %v1883_v22  ;;  %v1920_v60 = vmax.f32 %v1912_v21, 0.0  ;;  %v3777_v17 = vld [vmem:[%s4858_s4 + $0x60] sm:$0xff]   ;;  %v3779_v20 = vld [vmem:[%s4858_s4 + $0x70] sm:$0xff]   ;;  %v3780_v21 = vld [vmem:[%s4858_s4 + $0x78] sm:$0xff]  }
 0x3cf   :  { %v1911_v27 = vadd.f32 %v1903_v24, %v1875_v62  ;;  %v1918_v29 = vmax.f32 %v1910_v25, 0.0  ;;  %v3783_v22 = vld [vmem:[%s4865_s9 + $0x4] ss:$8 sps:$4 sm:$0xff]   ;;  %v3781_v61 = vld [vmem:[%s4865_s9] ss:$8 sps:$4 sm:$0xff]  }
 0x3d0   :  { %v1921_v28 = vmax.f32 %v1913_v26, 0.0  ;;  %2193 = vmatprep.subr.bf16.mxu0 %v3783_v22  ;;  %v3786_v24 = vld [vmem:[%s4865_s9 + $0x14] ss:$8 sps:$4 sm:$0xff]   ;;  %v3789_v25 = vld [vmem:[%s4865_s9 + $0x24] ss:$8 sps:$4 sm:$0xff]  }
 0x3d1   :  { %v1919_v18 = vmax.f32 %v1911_v27, 0.0  ;;  %v3528_v31 = vpop.f32.mrb[20].mxu1  ;;  %2194 = vmatpush1.bf16.msra.mxu0 %v3781_v61  ;;  %v3787_v62 = vld [vmem:[%s4865_s9 + $0x20] ss:$8 sps:$4 sm:$0xff]   ;;  %v3792_v26 = vld [vmem:[%s4865_s9 + $0x34] ss:$8 sps:$4 sm:$0xff]  }
 0x3d2   :  { %v1927_v33 = vpack.c.bf16 %v1921_v28, %v1920_v60  ;;  %v1896_v34 = vadd.f32 %v3528_v31, %v1793_v30  ;;  %v1887_v35 = vpop.f32.mrb[21].mxu1  ;;  %2195 = vmatprep.subr.bf16.mxu0 %v3786_v24  ;;  %v3790_v27 = vld [vmem:[%s4865_s9 + $0x30] ss:$8 sps:$4 sm:$0xff]   ;;  %v3795_v60 = vld [vmem:[%s4865_s9 + $0x44] ss:$8 sps:$4 sm:$0xff]  }
 0x3d3   :  { %v1926_v37 = vpack.c.bf16 %v1919_v18, %v1918_v29  ;;  %v1888_v39 = vadd.f32 %v1887_v35, %v1783_v16  ;;  %v3529_v23 = vpop.f32.mrb[22].mxu1  ;;  %v3776_v16 = vld [vmem:[%s4858_s4 + $0x58] sm:$0xff]   ;;  %v3793_v28 = vld [vmem:[%s4865_s9 + $0x40] ss:$8 sps:$4 sm:$0xff]   ;;  %v3801_v30 = vld [vmem:[%s4865_s9 + $0x64] ss:$8 sps:$4 sm:$0xff]  }
 0x3d4   :  { %v1916_v41 = vadd.f32 %v1908_v32, %v1896_v34  ;;  %v1899_v42 = vadd.f32 %v3529_v23, %v1798_v38  ;;  %v1890_v43 = vpop.f32.mrb[23].mxu1  ;;  %v3798_v29 = vld [vmem:[%s4865_s9 + $0x54] ss:$8 sps:$4 sm:$0xff]   ;;  %v3796_v18 = vld [vmem:[%s4865_s9 + $0x50] ss:$8 sps:$4 sm:$0xff]  }
 0x3d5   :  { %v1914_v53 = vadd.f32 %v1906_v36, %v1888_v39  ;;  %v1891_v54 = vadd.f32 %v1890_v43, %v1788_v59  ;;  %3531 = vmatpush3.bf16.msra.mxu1 %v1926_v37  ;;  %v3784_v59 = vld [vmem:[%s4865_s9 + $0x10] ss:$8 sps:$4 sm:$0xff]   ;;  %v3799_v31 = vld [vmem:[%s4865_s9 + $0x60] ss:$8 sps:$4 sm:$0xff]   ;;  %v3804_v32 = vld [vmem:[%s4865_s9 + $0x74] ss:$8 sps:$4 sm:$0xff]  }
 0x3d6   :  { %v1917_v1 = vadd.f32 %v1909_v40, %v1899_v42  ;;  %3532 = vmatprep.subr.bf16.mxu1 %v3841_v6  ;;  %v1924_v63 = vmax.f32 %v1916_v41, 0.0  ;;  %2196 = vmatpush1.bf16.msra.mxu0 %v3784_v59  ;;  %v3805_v34 = vld [vmem:[%s4865_s9 + $0x80] ss:$8 sps:$4 sm:$0xff]   ;;  %v3807_v35 = vld [vmem:[%s4865_s9 + $0x84] ss:$8 sps:$4 sm:$0xff]  }
 0x3d7   :  { %v1915_v55 = vadd.f32 %v1907_v52, %v1891_v54  ;;  %v1922_v57 = vmax.f32 %v1914_v53, 0.0  ;;  %2197 = vmatprep.subr.bf16.mxu0 %v3789_v25  ;;  %v3810_v36 = vld [vmem:[%s4865_s9 + $0x94] ss:$8 sps:$4 sm:$0xff]   ;;  %v3808_v37 = vld [vmem:[%s4865_s9 + $0x90] ss:$8 sps:$4 sm:$0xff]  }
 0x3d8   :  { %v1925_v56 = vmax.f32 %v1917_v1, 0.0  ;;  %v3813_v38 = vld [vmem:[%s4865_s9 + $0xa4] ss:$8 sps:$4 sm:$0xff]   ;;  %v3811_v39 = vld [vmem:[%s4865_s9 + $0xa0] ss:$8 sps:$4 sm:$0xff]  }
 0x3d9   :  { %v1923_v2 = vmax.f32 %v1915_v55, 0.0  ;;  %3533 = vmatpush3.bf16.msra.mxu1 %v1927_v33  ;;  %v3802_v33 = vld [vmem:[%s4865_s9 + $0x70] ss:$8 sps:$4 sm:$0xff]   ;;  %v3816_v23 = vld [vmem:[%s4865_s9 + $0xb4] ss:$8 sps:$4 sm:$0xff]  }
 0x3da   :  { %v1929_v58 = vpack.c.bf16 %v1925_v56, %v1924_v63  ;;  %3534 = vmatprep.subr.bf16.mxu1 %v3841_v6  ;;  %2198 = vmatpush1.bf16.msra.mxu0 %v3787_v62  ;;  %v3814_v40 = vld [vmem:[%s4865_s9 + $0xb0] ss:$8 sps:$4 sm:$0xff]   ;;  %v3819_v41 = vld [vmem:[%s4865_s9 + $0xc4] ss:$8 sps:$4 sm:$0xff]   ;;  %v3817_v42 = vld [vmem:[%s4865_s9 + $0xc0] ss:$8 sps:$4 sm:$0xff]  }
 0x3db   :  { %v1928_v0 = vpack.c.bf16 %v1923_v2, %v1922_v57  ;;  %2199 = vmatprep.subr.bf16.mxu0 %v3792_v26  ;;  %v3822_v43 = vld [vmem:[%s4865_s9 + $0xd4] ss:$8 sps:$4 sm:$0xff]   ;;  %v3820_v52 = vld [vmem:[%s4865_s9 + $0xd0] ss:$8 sps:$4 sm:$0xff]   ;;  %v3825_v53 = vld [vmem:[%s4865_s9 + $0xe4] ss:$8 sps:$4 sm:$0xff]  }
 0x3dc   :  { %v3823_v54 = vld [vmem:[%s4865_s9 + $0xe0] ss:$8 sps:$4 sm:$0xff]   ;;  %v3828_v1 = vld [vmem:[%s4865_s9 + $0xf4] ss:$8 sps:$4 sm:$0xff]   ;;  %v3826_v55 = vld [vmem:[%s4865_s9 + $0xf0] ss:$8 sps:$4 sm:$0xff]  }
 0x3dd   :  { %3535 = vmatpush3.bf16.msra.mxu1 %v1928_v0 }
 0x3de   :  { %3536 = vmatprep.subr.bf16.mxu1 %v3841_v6  ;;  %2200 = vmatpush1.bf16.msra.mxu0 %v3790_v27 }
 0x3df   :  { %2201 = vmatprep.subr.bf16.mxu0 %v3795_v60 }
 0x3e1   :  { %3537 = vmatpush3.bf16.msra.mxu1 %v1929_v58 }
 0x3e2   :  { %3542 = vmatprep.subr.bf16.mxu1 %v4355_v44  ;;  %2202 = vmatpush1.bf16.msra.mxu0 %v3793_v28 }
 0x3e3   :  { %2203 = vmatprep.subr.bf16.mxu0 %v3798_v29 }
 0x3e4   :  { %3539 = vmatmul.mubr.msk.bf16.vlgmr.msra.gmra.mrb[24].mxu1 %vm1824_vm4, %v3764_v4 }
 0x3e5   :  { %3544 = vmatprep.mubr.bf16.mxu1 %v3765_v5 }
 0x3e6   :  { %2204 = vmatpush1.bf16.msra.mxu0 %v3796_v18 }
 0x3e7   :  { %2205 = vmatprep.subr.bf16.mxu0 %v3801_v30 }
 0x3ea   :  { %3543 = vmatpush3.bf16.xpose.msra.mxu1 %v4355_v44  ;;  %v3770_v44 = vld [vmem:[%s4858_s4 + $0x28] sm:$0xff]   ;;  %2206 = vmatpush1.bf16.msra.mxu0 %v3799_v31 }
 0x3eb   :  { %3107 = vmatprep.subr.bf16.mxu1 %v3783_v22  ;;  %2207 = vmatprep.subr.bf16.mxu0 %v3804_v32 }
 0x3ee   :  { %2208 = vmatpush1.bf16.msra.mxu0 %v3802_v33 }
 0x3ef   :  { %2209 = vmatprep.subr.bf16.mxu0 %v3807_v35 }
 0x3f1   :  { %3545 = vmatmul.mubr.bf16.vlgmr.msra.gmra.mrb[28].mxu1 %v3766_v7 }
 0x3f2   :  { %3548 = vmatprep.mubr.bf16.mxu1 %v3767_v8  ;;  %3108 = vmatpush1.bf16.msra.mxu1 %v3781_v61 }
 0x3f3   :  { %3109 = vmatprep.subr.bf16.mxu1 %v3786_v24  ;;  %2210 = vmatpush1.bf16.msra.mxu0 %v3805_v34 }
 0x3f4   :  { %2211 = vmatprep.subr.bf16.mxu0 %v3810_v36 }
 0x3f6   :  { %3110 = vmatpush1.bf16.msra.mxu1 %v3784_v59  ;;  %v3829_v59 = vld [vmem:[%s4861_s5] sm:$0xff]  }
 0x3f7   :  { %3111 = vmatprep.subr.bf16.mxu1 %v3789_v25  ;;  %2212 = vmatpush1.bf16.msra.mxu0 %v3808_v37 }
 0x3f8   :  { %2213 = vmatprep.subr.bf16.mxu0 %v3813_v38 }
 0x3f9   :  { %3549 = vmatmul.mubr.bf16.gmra.mrb[32].mxu1 %v3768_v9 }
 0x3fa   :  { %3552 = vmatprep.mubr.bf16.mxu1 %v3769_v10  ;;  %3112 = vmatpush1.bf16.msra.mxu1 %v3787_v62 }
 0x3fb   :  { %3113 = vmatprep.subr.bf16.mxu1 %v3792_v26  ;;  %2214 = vmatpush1.bf16.msra.mxu0 %v3811_v39 }
 0x3fc   :  { %2215 = vmatprep.subr.bf16.mxu0 %v3816_v23 }
 0x3fe   :  { %3114 = vmatpush1.bf16.msra.mxu1 %v3790_v27 }
 0x3ff   :  { %3115 = vmatprep.subr.bf16.mxu1 %v3795_v60  ;;  %2216 = vmatpush1.bf16.msra.mxu0 %v3814_v40 }
 0x400   :  { %2217 = vmatprep.subr.bf16.mxu0 %v3819_v41 }
 0x401   :  { %3553 = vmatmul.mubr.bf16.gmra.mrb[36].mxu1 %v3770_v44 }
 0x402   :  { %3556 = vmatprep.mubr.bf16.mxu1 %v3771_v11  ;;  %3116 = vmatpush1.bf16.msra.mxu1 %v3793_v28 }
 0x403   :  { %3117 = vmatprep.subr.bf16.mxu1 %v3798_v29  ;;  %2218 = vmatpush1.bf16.msra.mxu0 %v3817_v42 }
 0x404   :  { %2219 = vmatprep.subr.bf16.mxu0 %v3822_v43 }
 0x406   :  { %3118 = vmatpush1.bf16.msra.mxu1 %v3796_v18 }
 0x407   :  { %3119 = vmatprep.subr.bf16.mxu1 %v3801_v30  ;;  %2220 = vmatpush1.bf16.msra.mxu0 %v3820_v52 }
 0x408   :  { %2221 = vmatprep.subr.bf16.mxu0 %v3825_v53 }
 0x409   :  { %3557 = vmatmul.mubr.bf16.gmra.mrb[40].mxu1 %v3772_v12 }
 0x40a   :  { %3560 = vmatprep.mubr.bf16.mxu1 %v3773_v13  ;;  %3120 = vmatpush1.bf16.msra.mxu1 %v3799_v31 }
 0x40b   :  { %3121 = vmatprep.subr.bf16.mxu1 %v3804_v32  ;;  %2222 = vmatpush1.bf16.msra.mxu0 %v3823_v54 }
 0x40c   :  { %2223 = vmatprep.subr.bf16.mxu0 %v3828_v1 }
 0x40e   :  { %3122 = vmatpush1.bf16.msra.mxu1 %v3802_v33 }
 0x40f   :  { %3123 = vmatprep.subr.bf16.mxu1 %v3807_v35  ;;  %2224 = vmatpush1.bf16.msra.mxu0 %v3826_v55 }
 0x410   :  { %3576 = vmatprep.subr.bf16.mxu0 %v3829_v59 }
 0x411   :  { %3561 = vmatmul.mubr.bf16.gmra.mrb[44].mxu1 %v3774_v14 }
 0x412   :  { %3564 = vmatprep.mubr.bf16.mxu1 %v3775_v15  ;;  %3124 = vmatpush1.bf16.msra.mxu1 %v3805_v34 }
 0x413   :  { %3125 = vmatprep.subr.bf16.mxu1 %v3810_v36 }
 0x416   :  { %3126 = vmatpush1.bf16.msra.mxu1 %v3808_v37 }
 0x417   :  { %3127 = vmatprep.subr.bf16.mxu1 %v3813_v38 }
 0x419   :  { %3565 = vmatmul.mubr.bf16.gmra.mrb[48].mxu1 %v3776_v16 }
 0x41a   :  { %3568 = vmatprep.mubr.bf16.mxu1 %v3777_v17  ;;  %3128 = vmatpush1.bf16.msra.mxu1 %v3811_v39 }
 0x41b   :  { %3129 = vmatprep.subr.bf16.mxu1 %v3816_v23 }
 0x41e   :  { %3130 = vmatpush1.bf16.msra.mxu1 %v3814_v40 }
 0x41f   :  { %3131 = vmatprep.subr.bf16.mxu1 %v3819_v41 }
 0x421   :  { %3569 = vmatmul.mubr.bf16.gmra.mrb[52].mxu1 %v3778_v19 }
 0x422   :  { %3572 = vmatprep.mubr.bf16.mxu1 %v3779_v20  ;;  %3132 = vmatpush1.bf16.msra.mxu1 %v3817_v42 }
 0x423   :  { %3133 = vmatprep.subr.bf16.mxu1 %v3822_v43 }
 0x426   :  { %3134 = vmatpush1.bf16.msra.mxu1 %v3820_v52 }
 0x427   :  { %3135 = vmatprep.subr.bf16.mxu1 %v3825_v53 }
 0x429   :  { %3573 = vmatmul.mubr.bf16.gmra.mrb[56].mxu1 %v3780_v21 }
 0x42a   :  { %3136 = vmatpush1.bf16.msra.mxu1 %v3823_v54  ;;  %v2027_v54 = vld [vmem:[%s4866_s10] sm:$0xf] }
 0x42b   :  { %3137 = vmatprep.subr.bf16.mxu1 %v3828_v1 }
 0x42e   :  { %3138 = vmatpush1.bf16.msra.mxu1 %v3826_v55  ;;  %v3832_v55 = vld [vmem:[%s4861_s5 + $0x18] sm:$0xff]  }
 0x4b7   :  { %v4706_v63 = vpop.f32.mrb[24].mxu1 }
 0x4b8   :  { %v1982_v56 = vrot.slane %v4706_v63, 4  ;;  %v3540_v57 = vpop.f32.mrb[25].mxu1 }
 0x4b9   :  { %v4709_v2 = vpop.f32.mrb[26].mxu1 }
 0x4ba   :  { %v1987_v58 = vrot.slane %v4709_v2, 4  ;;  %v3541_v0 = vpop.f32.mrb[27].mxu1 }
 0x4bc   :  { %v3674_v4 = vpack.i.bf16 %v1982_v56, %v1987_v58 }
 0x4be   :  { %3675 = vrot.lane.b32.xlu1 %v3674_v4, %s3843_s30 }
 0x4c4   :  { %v4713_v5 = vpop.f32.mrb[28].mxu1 }
 0x4c5   :  { %v4715_v7 = vpop.f32.mrb[29].mxu1 }
 0x4c6   :  { %v4717_v8 = vpop.f32.mrb[30].mxu1 }
 0x4c7   :  { %v4719_v9 = vpop.f32.mrb[31].mxu1 }
 0x4cc   :  { %v4721_v10 = vpop.f32.mrb[32].mxu1 }
 0x4cd   :  { %v4723_v44 = vpop.f32.mrb[33].mxu1 }
 0x4ce   :  { %v4725_v11 = vpop.f32.mrb[34].mxu1 }
 0x4cf   :  { %v4727_v12 = vpop.f32.mrb[35].mxu1 }
 0x4d4   :  { %v3554_v13 = vpop.f32.mrb[36].mxu1 }
 0x4d5   :  { %v2439_v14 = vpop.f32.mrb[37].mxu1 }
 0x4d6   :  { %v3555_v15 = vpop.f32.mrb[38].mxu1 }
 0x4d7   :  { %v3679_v16 = vpack.i.bf16 %v3555_v15, %v3554_v13  ;;  %v2442_v17 = vpop.f32.mrb[39].mxu1 }
 0x4d8   :  { %v3684_v19 = vpack.i.bf16 %v2442_v17, %v2439_v14 }
 0x4d9   :  { %3680 = vrot.lane.b32.xlu1 %v3679_v16, %s3838_s16 }
 0x4da   :  { %3685 = vrot.lane.b32.xlu0 %v3684_v19, %s3838_s16 }
 0x4dc   :  { %v3558_v20 = vpop.f32.mrb[40].mxu1 }
 0x4dd   :  { %v2455_v21 = vpop.f32.mrb[41].mxu1 }
 0x4de   :  { %v3559_v22 = vpop.f32.mrb[42].mxu1 }
 0x4df   :  { %v3689_v61 = vpack.i.bf16 %v3559_v22, %v3558_v20  ;;  %v2458_v24 = vpop.f32.mrb[43].mxu1 }
 0x4e0   :  { %v3694_v25 = vpack.i.bf16 %v2458_v24, %v2455_v21 }
 0x4e1   :  { %3690 = vrot.lane.b32.xlu1 %v3689_v61, %s3838_s16 }
 0x4e2   :  { %3695 = vrot.lane.b32.xlu0 %v3694_v25, %s3838_s16 }
 0x4e4   :  { %v3562_v62 = vpop.f32.mrb[44].mxu1 }
 0x4e5   :  { %v2471_v26 = vpop.f32.mrb[45].mxu1 }
 0x4e6   :  { %v3563_v27 = vpop.f32.mrb[46].mxu1 }
 0x4e7   :  { %v3699_v60 = vpack.i.bf16 %v3563_v27, %v3562_v62  ;;  %v2474_v28 = vpop.f32.mrb[47].mxu1 }
 0x4e8   :  { %v3704_v29 = vpack.i.bf16 %v2474_v28, %v2471_v26 }
 0x4e9   :  { %3700 = vrot.lane.b32.xlu1 %v3699_v60, %s3839_s22 }
 0x4ea   :  { %3705 = vrot.lane.b32.xlu0 %v3704_v29, %s3839_s22 }
 0x4ec   :  { %v3566_v18 = vpop.f32.mrb[48].mxu1 }
 0x4ed   :  { %v2487_v30 = vpop.f32.mrb[49].mxu1 }
 0x4ee   :  { %v3567_v31 = vpop.f32.mrb[50].mxu1 }
 0x4ef   :  { %v3724_v32 = vpack.i.bf16 %v3567_v31, %v3566_v18  ;;  %v2490_v33 = vpop.f32.mrb[51].mxu1 }
 0x4f0   :  { %v3719_v34 = vpack.i.bf16 %v2490_v33, %v2487_v30 }
 0x4f4   :  { %v3570_v35 = vpop.f32.mrb[52].mxu1 }
 0x4f5   :  { %v2503_v36 = vpop.f32.mrb[53].mxu1 }
 0x4f6   :  { %v3571_v37 = vpop.f32.mrb[54].mxu1 }
 0x4f7   :  { %v3709_v38 = vpack.i.bf16 %v3571_v37, %v3570_v35  ;;  %v2506_v39 = vpop.f32.mrb[55].mxu1 }
 0x4f8   :  { %v3714_v23 = vpack.i.bf16 %v2506_v39, %v2503_v36 }
 0x4f9   :  { %3710 = vrot.lane.b32.xlu1 %v3709_v38, %s3840_s24 }
 0x4fa   :  { %3715 = vrot.lane.b32.xlu0 %v3714_v23, %s3840_s24 }
 0x4fc   :  { %v3574_v40 = vpop.f32.mrb[56].mxu1 }
 0x4fd   :  { %3725 = vrot.lane.b32.xlu1 %v3724_v32, %s3839_s22  ;;  %v2519_v41 = vpop.f32.mrb[57].mxu1 }
 0x4fe   :  { %3720 = vrot.lane.b32.xlu0 %v3719_v34, %s3839_s22  ;;  %v3575_v42 = vpop.f32.mrb[58].mxu1 }
 0x4ff   :  { %v3734_v43 = vpack.i.bf16 %v3575_v42, %v3574_v40  ;;  %v2522_v52 = vpop.f32.mrb[59].mxu1 }
 0x500   :  { %v3729_v53 = vpack.i.bf16 %v2522_v52, %v2519_v41 }
 0x501   :  { %3735 = vrot.lane.b32.xlu1 %v3734_v43, %s3840_s24 }
 0x502   :  { %3730 = vrot.lane.b32.xlu0 %v3729_v53, %s3840_s24 }
 0x505   :  { %2681 = vperm.xlu1 %3673, %v4445_v45  }
 0x506   :  { %2676 = vperm.xlu0 %3672, %v4450_v46  }
 0x509   :  { %2691 = vperm.xlu1 %3673, %v4462_v47  }
 0x50a   :  { %2686 = vperm.xlu0 %3672, %v4457_v3  }
 0x50d   :  { %2701 = vperm.xlu1 %3673, %v4474_v49  }
 0x50e   :  { %2696 = vperm.xlu0 %3672, %v4469_v48  }
 0x511   :  { %2711 = vperm.xlu1 %3673, %v4486_v51   ;;  %v3831_v51 = vld [vmem:[%s4861_s5 + $0x10] sm:$0xff]  }
 0x512   :  { %2706 = vperm.xlu0 %3672, %v4481_v50   ;;  %v3830_v50 = vld [vmem:[%s4861_s5 + $0x8] sm:$0xff]  }
 0x515   :  { %2030 = vperm.xlu1 %3673, %v2027_v54  }
 0x530   :  { %v3676_v45 = vpop.permute.xlu1 %3675 }
 0x531   :  { %v3678_v1 = vunpack.i.h.bf16 %v3676_v45  ;;  %v3677_v46 = vunpack.i.l.bf16 %v3676_v45 }
 0x533   :  { %v1991_v47 = vsel %vm1824_vm4, %v4706_v63, %v3678_v1  ;;  %v1992_v3 = vsel %vm1824_vm4, %v4709_v2, %v3677_v46 }
 0x534   :  { %v1993_v49 = vpack.c.bf16 %v1991_v47, %v1991_v47  ;;  %v1994_v48 = vpack.c.bf16 %v1992_v3, %v1992_v3 }
 0x536   :  { %2225 = vmatprep.mubr.bf16.mxu0 %v1994_v48 }
 0x537   :  { %2226 = vmatmul.mubr.bf16.vlgmr.msra.gmra.mrb[48].mxu0 %v1993_v49 }
 0x538   :  { %3577 = vmatpush3.bf16.msra.mxu0 %v3829_v59 }
 0x539   :  { %3578 = vmatprep.subr.bf16.mxu0 %v3830_v50 }
 0x53c   :  { %3579 = vmatpush3.bf16.msra.mxu0 %v3830_v50 }
 0x53d   :  { %3580 = vmatprep.subr.bf16.mxu0 %v3831_v51 }
 0x540   :  { %3581 = vmatpush3.bf16.msra.mxu0 %v3831_v51 }
 0x541   :  { %3582 = vmatprep.subr.bf16.mxu0 %v3832_v55 }
 0x544   :  { %3583 = vmatpush3.bf16.msra.mxu0 %v3832_v55 }
 0x545   :  { %3592 = vmatprep.subr.bf16.mxu0 %v3841_v6 }
 0x54b   :  { %v3681_v63 = vpop.permute.xlu1 %3680 }
 0x54c   :  { %v3686_v56 = vpop.permute.xlu0 %3685  ;;  %v3683_v0 = vunpack.i.h.bf16 %v3681_v63  ;;  %v3682_v4 = vunpack.i.l.bf16 %v3681_v63 }
 0x54d   :  { %v3688_v13 = vunpack.i.h.bf16 %v3686_v56  ;;  %v3687_v15 = vunpack.i.l.bf16 %v3686_v56 }
 0x54e   :  { %v2633_v21 = vsel %vm1713_vm1, %v4717_v8, %v3683_v0  ;;  %v2632_v22 = vsel %vm1713_vm1, %v4713_v5, %v3682_v4  ;;  %v2234_v0 = vld [vmem:[%s4867_s11] sm:$0xff] }
 0x54f   :  { %v2631_v61 = vsel %vm1713_vm1, %v4719_v9, %v3688_v13  ;;  %v2630_v59 = vsel %vm1713_vm1, %v4715_v7, %v3687_v15 }
 0x553   :  { %v3691_v57 = vpop.permute.xlu1 %3690 }
 0x554   :  { %v3696_v2 = vpop.permute.xlu0 %3695  ;;  %v3693_v25 = vunpack.i.h.bf16 %v3691_v57  ;;  %v3692_v31 = vunpack.i.l.bf16 %v3691_v57 }
 0x555   :  { %v3698_v35 = vunpack.i.h.bf16 %v3696_v2  ;;  %v3697_v36 = vunpack.i.l.bf16 %v3696_v2 }
 0x556   :  { %v2637_v42 = vsel %vm1713_vm1, %v4725_v11, %v3693_v25  ;;  %v2636_v43 = vsel %vm1713_vm1, %v4721_v10, %v3692_v31  ;;  %v3377_v31 = vld [vmem:[%s4864_s7 + $0x48] sm:$0xff] }
 0x557   :  { %v2635_v53 = vsel %vm1713_vm1, %v4727_v12, %v3698_v35  ;;  %v2634_v54 = vsel %vm1713_vm1, %v4723_v44, %v3697_v36 }
 0x55b   :  { %v3701_v58 = vpop.permute.xlu1 %3700 }
 0x55c   :  { %v3706_v14 = vpop.permute.xlu0 %3705  ;;  %v3703_v16 = vunpack.i.h.bf16 %v3701_v58  ;;  %v3702_v17 = vunpack.i.l.bf16 %v3701_v58 }
 0x55d   :  { %v3708_v19 = vunpack.i.h.bf16 %v3706_v14  ;;  %v3707_v20 = vunpack.i.l.bf16 %v3706_v14  ;;  %v2236_v14 = vcombine.high %v2234_v0, %v2234_v0 }
 0x55e   :  { %v2641_v60 = vsel %vm1722_vm2, %v2633_v21, %v3703_v16  ;;  %v2640_v28 = vsel %vm1722_vm2, %v2632_v22, %v3702_v17 }
 0x55f   :  { %v2639_v18 = vsel %vm1722_vm2, %v2631_v61, %v3708_v19  ;;  %v2638_v5 = vsel %vm1722_vm2, %v2630_v59, %v3707_v20 }
 0x56b   :  { %v3711_v24 = vpop.permute.xlu1 %3710 }
 0x56c   :  { %v3713_v62 = vunpack.i.h.bf16 %v3711_v24  ;;  %v3712_v26 = vunpack.i.l.bf16 %v3711_v24  ;;  %v3716_v27 = vpop.permute.xlu0 %3715 }
 0x56d   :  { %v3718_v29 = vunpack.i.h.bf16 %v3716_v27  ;;  %v3717_v8 = vunpack.i.l.bf16 %v3716_v27 }
 0x56e   :  { %v2649_v9 = vsel %vm1731_vm3, %v2641_v60, %v3713_v62  ;;  %v2648_v30 = vsel %vm1731_vm3, %v2640_v28, %v3712_v26  ;;  %v3378_v62 = vld [vmem:[%s4864_s7 + $0x50] sm:$0xff]  ;;  %v3376_v60 = vld [vmem:[%s4864_s7 + $0x40] sm:$0xff] }
 0x56f   :  { %v2655_v7 = vpack.c.bf16 %v2649_v9, %v2648_v30  ;;  %v2647_v32 = vsel %vm1731_vm3, %v2639_v18, %v3718_v29  ;;  %v2646_v33 = vsel %vm1731_vm3, %v2638_v5, %v3717_v8  ;;  %v3726_v34 = vpop.permute.xlu1 %3725  ;;  %v3379_v18 = vld [vmem:[%s4864_s7 + $0x58] sm:$0xff] }
 0x570   :  { %v2654_v37 = vpack.c.bf16 %v2647_v32, %v2646_v33  ;;  %v3721_v38 = vpop.permute.xlu0 %3720  ;;  %v3728_v39 = vunpack.i.h.bf16 %v3726_v34  ;;  %v3727_v23 = vunpack.i.l.bf16 %v3726_v34 }
 0x571   :  { %v3723_v40 = vunpack.i.h.bf16 %v3721_v38  ;;  %v3722_v41 = vunpack.i.l.bf16 %v3721_v38 }
 0x572   :  { %3584 = vmatprep.mubr.msk.bf16.mxu0 %vm1824_vm4, %v2654_v37  ;;  %v2645_v47 = vsel %vm1722_vm2, %v2637_v42, %v3728_v39  ;;  %v2644_v3 = vsel %vm1722_vm2, %v2636_v43, %v3727_v23 }
 0x573   :  { %3585 = vmatmul.mubr.msk.bf16.vlgmr.msra.gmra.mrb[52].mxu0 %vm1824_vm4, %v2655_v7  ;;  %v3736_v52 = vpop.permute.xlu1 %3735  ;;  %v2643_v10 = vsel %vm1722_vm2, %v2635_v53, %v3723_v40  ;;  %v2642_v48 = vsel %vm1722_vm2, %v2634_v54, %v3722_v41  ;;  %v3382_v40 = vld [vmem:[%s4864_s7 + $0x70] sm:$0xff] }
 0x574   :  { %v3738_v45 = vunpack.i.h.bf16 %v3736_v52  ;;  %v3737_v1 = vunpack.i.l.bf16 %v3736_v52  ;;  %v3731_v46 = vpop.permute.xlu0 %3730  ;;  %v3380_v52 = vld [vmem:[%s4864_s7 + $0x60] sm:$0xff] }
 0x575   :  { %v3733_v11 = vunpack.i.h.bf16 %v3731_v46  ;;  %v3732_v49 = vunpack.i.l.bf16 %v3731_v46 }
 0x576   :  { %v2653_v50 = vsel %vm1731_vm3, %v2645_v47, %v3738_v45  ;;  %v2652_v12 = vsel %vm1731_vm3, %v2644_v3, %v3737_v1  ;;  %v3383_v1 = vld [vmem:[%s4864_s7 + $0x78] sm:$0xff] }
 0x577   :  { %v2657_v51 = vpack.c.bf16 %v2653_v50, %v2652_v12  ;;  %v2651_v44 = vsel %vm1731_vm3, %v2643_v10, %v3733_v11  ;;  %v2650_v55 = vsel %vm1731_vm3, %v2642_v48, %v3732_v49  ;;  %v3381_v11 = vld [vmem:[%s4864_s7 + $0x68] sm:$0xff] }
 0x578   :  { %v2656_v63 = vpack.c.bf16 %v2651_v44, %v2650_v55 }
 0x57a   :  { %3588 = vmatprep.mubr.msk.bf16.mxu0 %vm1824_vm4, %v2656_v63 }
 0x57b   :  { %3589 = vmatmul.mubr.msk.bf16.gmra.mrb[56].mxu0 %vm1824_vm4, %v2657_v51 }
 0x57c   :  { %3600 = vmatprep.mubr.msk.bf16.mxu0 %vm3842_vm5, %v3841_v6 }
 0x584   :  { %v2682_v56 = vpop.permute.xlu1 %2681 }
 0x585   :  { %v2677_v24 = vpop.permute.xlu0 %2676 }
 0x588   :  { %v2692_v57 = vpop.permute.xlu1 %2691 }
 0x589   :  { %v2687_v59 = vpop.permute.xlu0 %2686 }
 0x58c   :  { %v2702_v2 = vpop.permute.xlu1 %2701 }
 0x58d   :  { %v2697_v28 = vpop.permute.xlu0 %2696 }
 0x590   :  { %v2712_v58 = vpop.permute.xlu1 %2711 }
 0x591   :  { %v2707_v37 = vpop.permute.xlu0 %2706 }
 0x594   :  { %v2031_v4 = vpop.permute.xlu1 %2030 }
 0x60a   :  { %v2227_v13 = vpop.f32.mrb[48].mxu0 }
 0x60b   :  { %v2228_v15 = vadd.f32 %v2227_v13, %v2031_v4  ;;  %v2229_v16 = vpop.f32.mrb[49].mxu0 }
 0x60c   :  { %v2230_v17 = vadd.f32 %v2229_v16, %v2031_v4  ;;  %v2231_v19 = vpop.f32.mrb[50].mxu0 }
 0x60d   :  { %v2238_v20 = vadd.f32 %v2234_v0, %v2228_v15  ;;  %v2232_v21 = vpop.f32.mrb[51].mxu0 }
 0x60e   :  { %v2239_v22 = vadd.f32 %v2236_v14, %v2230_v17 }
 0x610   :  { %v2242_v61 = vcombine.low %v2238_v20, %v2239_v22 }
 0x612   :  { %2244 = vst [vmem:[%s4868_s12] sm:$0xff] %v2242_v61 }
 0x646   :  { %v3586_v25 = vpop.f32.mrb[52].mxu0 }
 0x647   :  { %v2793_v26 = vadd.f32 %v3586_v25, %v2687_v59  ;;  %v2784_v27 = vpop.f32.mrb[53].mxu0 }
 0x648   :  { %v2785_v29 = vadd.f32 %v2784_v27, %v2677_v24  ;;  %v3587_v8 = vpop.f32.mrb[54].mxu0  ;;  %v3418_v24 = vld [vmem:[%s4867_s11 + $0x8] sm:$0xff] }
 0x649   :  { %v2826_v5 = vadd.f32 %v3378_v62, %v2793_v26  ;;  %v2796_v9 = vadd.f32 %v3587_v8, %v2692_v57  ;;  %v2787_v30 = vpop.f32.mrb[55].mxu0  ;;  %v3834_v57 = vld [vmem:[%s4863_s8] sm:$0xff]   ;;  %v3151_v62 = vcombine.high %v3418_v24, %v3418_v24 }
 0x64a   :  { %v2824_v7 = vadd.f32 %v3376_v60, %v2785_v29  ;;  %v2788_v32 = vadd.f32 %v2787_v30, %v2682_v56 }
 0x64b   :  { %v2827_v33 = vadd.f32 %v3379_v18, %v2796_v9  ;;  %v2834_v35 = vmax.f32 %v2826_v5, 0.0 }
 0x64c   :  { %v2825_v34 = vadd.f32 %v3377_v31, %v2788_v32  ;;  %v2832_v38 = vmax.f32 %v2824_v7, 0.0 }
 0x64d   :  { %v2835_v36 = vmax.f32 %v2827_v33, 0.0 }
 0x64e   :  { %v2833_v39 = vmax.f32 %v2825_v34, 0.0  ;;  %v3590_v23 = vpop.f32.mrb[56].mxu0 }
 0x64f   :  { %v2841_v41 = vpack.c.bf16 %v2835_v36, %v2834_v35  ;;  %v2809_v42 = vadd.f32 %v3590_v23, %v2707_v37  ;;  %v2800_v43 = vpop.f32.mrb[57].mxu0 }
 0x650   :  { %v2840_v53 = vpack.c.bf16 %v2833_v39, %v2832_v38  ;;  %v2801_v54 = vadd.f32 %v2800_v43, %v2697_v28  ;;  %v3591_v45 = vpop.f32.mrb[58].mxu0 }
 0x651   :  { %v2830_v46 = vadd.f32 %v3382_v40, %v2809_v42  ;;  %v2812_v47 = vadd.f32 %v3591_v45, %v2712_v58  ;;  %v2803_v3 = vpop.f32.mrb[59].mxu0 }
 0x652   :  { %v2828_v49 = vadd.f32 %v3380_v52, %v2801_v54  ;;  %v2804_v10 = vadd.f32 %v2803_v3, %v2702_v2  ;;  %3593 = vmatpush3.bf16.msra.mxu0 %v2840_v53 }
 0x653   :  { %v2831_v48 = vadd.f32 %v3383_v1, %v2812_v47  ;;  %3594 = vmatprep.subr.bf16.mxu0 %v3841_v6  ;;  %v2838_v12 = vmax.f32 %v2830_v46, 0.0 }
 0x654   :  { %v2829_v50 = vadd.f32 %v3381_v11, %v2804_v10  ;;  %v2836_v44 = vmax.f32 %v2828_v49, 0.0 }
 0x655   :  { %v2839_v51 = vmax.f32 %v2831_v48, 0.0 }
 0x656   :  { %v2837_v55 = vmax.f32 %v2829_v50, 0.0  ;;  %3595 = vmatpush3.bf16.msra.mxu0 %v2841_v41 }
 0x657   :  { %v2843_v63 = vpack.c.bf16 %v2839_v51, %v2838_v12  ;;  %3596 = vmatprep.subr.bf16.mxu0 %v3841_v6 }
 0x658   :  { %v2842_v56 = vpack.c.bf16 %v2837_v55, %v2836_v44 }
 0x65a   :  { %3597 = vmatpush3.bf16.msra.mxu0 %v2842_v56 }
 0x65b   :  { %3598 = vmatprep.subr.bf16.mxu0 %v3841_v6  ;;  %v2941_v6 = vld [vmem:[%s4866_s10] sm:$0xf] }
 0x65e   :  { %3599 = vmatpush3.bf16.msra.mxu0 %v2843_v63 }
 0x661   :  { %3601 = vmatmul.mubr.msk.bf16.vlgmr.msra.gmra.mrb[60].mxu0 %vm1824_vm4, %v3834_v57 }
 0x734   :  { %v2888_v2 = vpop.f32.mrb[60].mxu0 }
 0x735   :  { %v3602_v58 = vpop.f32.mrb[61].mxu0  ;;  %v2896_v4 = vrot.slane %v2888_v2, 4 }
 0x736   :  { %v2891_v0 = vpop.f32.mrb[62].mxu0 }
 0x737   :  { %v2901_v13 = vrot.slane %v2891_v0, 4  ;;  %v3603_v14 = vpop.f32.mrb[63].mxu0 }
 0x739   :  { %v3739_v15 = vpack.i.bf16 %v2896_v4, %v2901_v13 }
 0x73b   :  { %3740 = vrot.lane.b32.xlu0 %v3739_v15, %s3843_s30 }
 0x73f   :  { %2944 = vperm.xlu0 %3672, %v2941_v6  }
 0x7ad   :  { %v3741_v16 = vpop.permute.xlu0 %3740 }
 0x7ae   :  { %v3743_v17 = vunpack.i.h.bf16 %v3741_v16  ;;  %v3742_v19 = vunpack.i.l.bf16 %v3741_v16 }
 0x7b0   :  { %v2905_v20 = vsel %vm1824_vm4, %v2888_v2, %v3743_v17  ;;  %v2906_v21 = vsel %vm1824_vm4, %v2891_v0, %v3742_v19 }
 0x7b1   :  { %v2907_v22 = vpack.c.bf16 %v2905_v20, %v2905_v20  ;;  %v2908_v61 = vpack.c.bf16 %v2906_v21, %v2906_v21 }
 0x7b3   :  { %3139 = vmatprep.mubr.bf16.mxu1 %v2908_v61 }
 0x7b4   :  { %3140 = vmatmul.mubr.bf16.vlgmr.msra.gmra.mrb[60].mxu1 %v2907_v22 }
 0x7be   :  { %v2945_v59 = vpop.permute.xlu0 %2944 }
 0x887   :  { %v3141_v25 = vpop.f32.mrb[60].mxu1 }
 0x888   :  { %v3142_v26 = vadd.f32 %v3141_v25, %v2945_v59  ;;  %v3143_v27 = vpop.f32.mrb[61].mxu1 }
 0x889   :  { %v3144_v60 = vadd.f32 %v3143_v27, %v2945_v59  ;;  %v3145_v28 = vpop.f32.mrb[62].mxu1 }
 0x88a   :  { %v3153_v29 = vadd.f32 %v3418_v24, %v3142_v26  ;;  %v3146_v8 = vpop.f32.mrb[63].mxu1 }
 0x88b   :  { %v3154_v18 = vadd.f32 %v3151_v62, %v3144_v60 }
 0x88d   :  { %v3157_v5 = vcombine.low %v3153_v29, %v3154_v18 }
 0x88f   :  { %3419 = vst [vmem:[%s4868_s12 + $0x8] sm:$0xff] %v3157_v5 }

</bundles_post_ra>
